<compile_context>
chip_gen: v7x
topology: tpu7x:2x2x1
jax: 0.10.0
libtpu: 0.0.40
codegen_flags: <defaults>
</compile_context>

<pallas_src>
import jax
import jax.numpy as jnp
from jax.experimental import pallas as pl
from jax.experimental.pallas import tpu as pltpu


# ---------------------------------------------------------------------------
# Fused kernel factory (static config baked in at trace time)
# ---------------------------------------------------------------------------

def _make_fused_kernel(*, use_exp, residual, K, stride, H, W, Ho, Wo, mid):
    pad = K // 2

    def kernel(*refs):
        it = iter(refs)
        x_ref = next(it)                                   # (1, Cin, H*W)
        if use_exp:
            wexp_ref, bexp_ref = next(it), next(it)        # (mid, Cin), (mid, 1)
        wdw_ref, bdw_ref = next(it), next(it)              # (K*K, mid), (1, mid)
        wproj_ref, bproj_ref = next(it), next(it)          # (Cout, mid), (Cout, 1)
        o_ref = next(it)                                   # (1, Cout, Ho*Wo)
        pad_ref = next(it)                                 # VMEM (Hp, Wp, mid) f32

        x = x_ref[0].astype(jnp.float32)                   # (Cin, H*W), lanes = H*W

        # ---- 1x1 expand (+folded BN) + ReLU; channels-first, lane-dense ------
        if use_exp:
            h = jnp.dot(wexp_ref[...], x,
                        preferred_element_type=jnp.float32)        # (mid, H*W)
            h = jnp.maximum(h + bexp_ref[...], 0.0)
        else:
            h = x                                                   # mid == Cin

        # ---- depthwise KxK (+folded BN) + ReLU; channels-last VMEM scratch ---
        # Zero the scratch (halo ring), then write the valid interior.  Padding
        # is handled entirely in VMEM — no HBM-level jnp.pad.
        pad_ref[...] = jnp.zeros(pad_ref.shape, jnp.float32)
        pad_ref[pad:pad + H, pad:pad + W, :] = h.T.reshape(H, W, mid)

        wdw = wdw_ref[...]                                  # (K*K, mid) hoisted
        acc = jnp.zeros((Ho, Wo, mid), jnp.float32)
        for kh in range(K):
            for kw in range(K):
                if stride == 1:
                    tap = pad_ref[kh:kh + Ho, kw:kw + Wo, :]
                else:
                    # Only the kept (strided) output positions are read/computed.
                    tap = pad_ref[pl.ds(kh, Ho, stride), pl.ds(kw, Wo, stride), :]
                t = kh * K + kw
                acc = acc + tap * wdw[t:t + 1, :][None]     # (1,1,mid) broadcast
        h2 = jnp.maximum(acc + bdw_ref[...][None], 0.0).reshape(Ho * Wo, mid)

        # ---- 1x1 project (+folded BN) (+ fused residual) ---------------------
        # A·Bᵀ contraction puts the result directly in (Cout, Ho*Wo): lane-dense
        # store and no explicit result transpose.
        y = jax.lax.dot_general(
            wproj_ref[...], h2,
            dimension_numbers=(((1,), (1,)), ((), ())),
            preferred_element_type=jnp.float32)             # (Cout, Ho*Wo)
        y = y + bproj_ref[...]
        if residual:
            y = y + x                                       # same shape when residual
        o_ref[0] = y.astype(o_ref.dtype)

    return kernel


# ---------------------------------------------------------------------------
# SPNASUnit module (parameters initialized deterministically in-script)
# ---------------------------------------------------------------------------

class SPNASUnitPallas:
    def __init__(self, in_channels, out_channels, stride, use_kernel3,
                 exp_factor, use_skip=True, key=None):
        assert exp_factor >= 1
        self.in_channels = in_channels
        self.out_channels = out_channels
        self.stride = stride
        self.residual = (in_channels == out_channels) and (stride == 1) and use_skip
        self.use_exp_conv = exp_factor > 1
        self.K = 3 if use_kernel3 else 5
        mid = exp_factor * in_channels
        self.mid = mid

        key = jax.random.PRNGKey(0) if key is None else key
        keys = jax.random.split(key, 6)
        eps = 1e-5

        def folded_bn(k, c):
            k0, k1, k2, k3 = jax.random.split(k, 4)
            gamma = 1.0 + 0.1 * jax.random.normal(k0, (c,), jnp.float32)
            beta = 0.1 * jax.random.normal(k1, (c,), jnp.float32)
            mean = 0.05 * jax.random.normal(k2, (c,), jnp.float32)
            var = 0.9 + 0.1 * jax.random.uniform(k3, (c,), jnp.float32)
            scale = gamma / jnp.sqrt(var + eps)
            bias = beta - mean * scale
            return scale, bias

        # expand 1x1 conv (channels-first), BN scale folded into the weight.
        w = 0.1 * jax.random.normal(keys[0], (mid, in_channels), jnp.float32)
        s, b = folded_bn(keys[1], mid)
        self.w_exp_f = w * s[:, None]                       # (mid, Cin)
        self.b_exp = b.reshape(mid, 1)
        # depthwise KxK conv stored as (K*K, mid) for channels-last broadcast.
        w = 0.1 * jax.random.normal(keys[2], (self.K * self.K, mid), jnp.float32)
        s, b = folded_bn(keys[3], mid)
        self.w_dw_f = w * s[None, :]                        # (K*K, mid)
        self.b_dw = b.reshape(1, mid)
        # projection 1x1 conv (channels-first), BN scale folded into the weight.
        w = 0.1 * jax.random.normal(keys[4], (out_channels, mid), jnp.float32)
        s, b = folded_bn(keys[5], out_channels)
        self.w_proj_f = w * s[:, None]                      # (Cout, mid)
        self.b_proj = b.reshape(out_channels, 1)

    def __call__(self, x_nchw):
        N, C, H, W = x_nchw.shape
        assert C == self.in_channels
        K, S = self.K, self.stride
        pad = K // 2
        Ho = (H - 1) // S + 1            # PyTorch conv, padding=K//2, odd K
        Wo = (W - 1) // S + 1
        hw, howo = H * W, Ho * Wo
        cout, mid = self.out_channels, self.mid

        # Free (metadata-only) reshape: NCHW is already channels-first.
        x3 = x_nchw.reshape(N, C, hw)

        kernel = _make_fused_kernel(
            use_exp=self.use_exp_conv, residual=self.residual,
            K=K, stride=S, H=H, W=W, Ho=Ho, Wo=Wo, mid=mid)

        def pinned(a):
            shp = a.shape
            return pl.BlockSpec(shp, lambda n: (0,) * len(shp))  # VMEM-resident

        operands = [x3]
        in_specs = [pl.BlockSpec((1, C, hw), lambda n: (n, 0, 0))]
        params = []
        if self.use_exp_conv:
            params += [self.w_exp_f, self.b_exp]
        params += [self.w_dw_f, self.b_dw, self.w_proj_f, self.b_proj]
        operands += params
        in_specs += [pinned(a) for a in params]

        flops = N * (
            (2 * hw * C * mid if self.use_exp_conv else 0)
            + 2 * howo * mid * K * K
            + 2 * howo * mid * cout)
        bytes_accessed = 4 * (N * (C * hw + cout * howo)
                              + sum(int(a.size) for a in params))

        out3 = pl.pallas_call(
            kernel,
            out_shape=jax.ShapeDtypeStruct((N, cout, howo), x_nchw.dtype),
            grid=(N,),
            in_specs=in_specs,
            out_specs=pl.BlockSpec((1, cout, howo), lambda n: (n, 0, 0)),
            scratch_shapes=[pltpu.VMEM((H + 2 * pad, W + 2 * pad, mid), jnp.float32)],
            compiler_params=pltpu.CompilerParams(
                dimension_semantics=("parallel",),        # dual-TC sharding on v7x
                vmem_limit_bytes=32 * 1024 * 1024),       # v7x-safe explicit budget
            cost_estimate=pl.CostEstimate(
                flops=flops, transcendentals=0, bytes_accessed=bytes_accessed),
        )(*operands)

        return out3.reshape(N, cout, Ho, Wo)               # NCHW out


# ---------------------------------------------------------------------------
# Pure-JAX reference (same folded-BN parameters) for a correctness check
# ---------------------------------------------------------------------------

def reference_forward(unit, x):
    N, C, H, W = x.shape
    K, S = unit.K, unit.stride
    pad = K // 2
    Ho = (H - 1) // S + 1
    Wo = (W - 1) // S + 1
    if unit.use_exp_conv:
        h = jnp.einsum('oi,nihw->nohw', unit.w_exp_f, x) \
            + unit.b_exp.reshape(1, unit.mid, 1, 1)
        h = jnp.maximum(h, 0.0)
    else:
        h = x
    hp = jnp.pad(h, ((0, 0), (0, 0), (pad, pad), (pad, pad)))
    acc = jnp.zeros((N, unit.mid, Ho, Wo), jnp.float32)
    for kh in range(K):
        for kw in range(K):
            tap = hp[:, :, kh:kh + (Ho - 1) * S + 1:S, kw:kw + (Wo - 1) * S + 1:S]
            acc = acc + tap * unit.w_dw_f[kh * K + kw].reshape(1, unit.mid, 1, 1)
    h2 = jnp.maximum(acc + unit.b_dw.reshape(1, unit.mid, 1, 1), 0.0)
    y = jnp.einsum('oc,nchw->nohw', unit.w_proj_f, h2) \
        + unit.b_proj.reshape(1, unit.out_channels, 1, 1)
    if unit.residual:
        y = y + x
    return y


if __name__ == "__main__":
    key = jax.random.PRNGKey(0)
    k_x, k_p = jax.random.split(key)

    # small shapes consistent with the module: N=2, C=4, H=W=16
    x = jax.random.normal(k_x, (2, 4, 16, 16), jnp.float32)

    unit = SPNASUnitPallas(in_channels=4, out_channels=4, stride=1,
                           use_kernel3=True, exp_factor=3, use_skip=True,
                           key=k_p)

    y = unit(x)
    y = jax.block_until_ready(y)

    assert y.shape == (2, 4, 16, 16), y.shape
    assert bool(jnp.all(jnp.isfinite(y)))

    y_ref = jax.block_until_ready(reference_forward(unit, x))
    assert bool(jnp.allclose(y, y_ref, rtol=1e-2, atol=1e-2)), \
        float(jnp.max(jnp.abs(y - y_ref)))

    print("KERNEL_OK")
</pallas_src>

<mosaic_0001>
module attributes {stable_mosaic.version = 11 : i64} {
  func.func @kernel(%arg0: i32, %arg1: memref<1x4x256xf32, #tpu.memory_space<vmem>>, %arg2: memref<12x4xf32, #tpu.memory_space<vmem>>, %arg3: memref<12x1xf32, #tpu.memory_space<vmem>>, %arg4: memref<9x12xf32, #tpu.memory_space<vmem>>, %arg5: memref<1x12xf32, #tpu.memory_space<vmem>>, %arg6: memref<4x12xf32, #tpu.memory_space<vmem>>, %arg7: memref<4x1xf32, #tpu.memory_space<vmem>>, %arg8: memref<1x4x256xf32, #tpu.memory_space<vmem>>, %arg9: memref<18x18x12xf32, #tpu.memory_space<vmem>>) attributes {dimension_semantics = [#tpu.dimension_semantics<parallel>], iteration_bounds = array<i64: 2>, scalar_prefetch = 0 : i64, scratch_operands = 1 : i64, tpu.core_type = #tpu.core_type<tc>, window_params = [{transform_indices = @transform_0, window_bounds = array<i64: 1, 4, 256>}, {pipeline_mode = #tpu.pipeline_mode<synchronous>, transform_indices = @transform_1, window_bounds = array<i64: 12, 4>}, {pipeline_mode = #tpu.pipeline_mode<synchronous>, transform_indices = @transform_2, window_bounds = array<i64: 12, 1>}, {pipeline_mode = #tpu.pipeline_mode<synchronous>, transform_indices = @transform_3, window_bounds = array<i64: 9, 12>}, {pipeline_mode = #tpu.pipeline_mode<synchronous>, transform_indices = @transform_4, window_bounds = array<i64: 1, 12>}, {pipeline_mode = #tpu.pipeline_mode<synchronous>, transform_indices = @transform_5, window_bounds = array<i64: 4, 12>}, {pipeline_mode = #tpu.pipeline_mode<synchronous>, transform_indices = @transform_6, window_bounds = array<i64: 4, 1>}, {transform_indices = @transform_7, window_bounds = array<i64: 1, 4, 256>}]} {
    %c0 = arith.constant 0 : index
    %c0_0 = arith.constant 0 : index
    %c0_1 = arith.constant 0 : index
    %0 = vector.load %arg1[%c0, %c0_0, %c0_1] : memref<1x4x256xf32, #tpu.memory_space<vmem>>, vector<1x4x256xf32>
    %1 = vector.shape_cast %0 : vector<1x4x256xf32> to vector<4x256xf32>
    %c0_2 = arith.constant 0 : index
    %c0_3 = arith.constant 0 : index
    %2 = vector.load %arg2[%c0_2, %c0_3] : memref<12x4xf32, #tpu.memory_space<vmem>>, vector<12x4xf32>
    %cst = arith.constant dense<0.000000e+00> : vector<12x256xf32>
    %3 = tpu.matmul %2, %1, %cst {dimension_numbers = #tpu.dot_dimension_numbers<[1], [0], [0], [1], [0, 0, 1, 1], [], []>} : vector<12x4xf32>, vector<4x256xf32>, vector<12x256xf32> -> vector<12x256xf32>
    %c0_4 = arith.constant 0 : index
    %c0_5 = arith.constant 0 : index
    %4 = vector.load %arg3[%c0_4, %c0_5] : memref<12x1xf32, #tpu.memory_space<vmem>>, vector<12x1xf32>
    %5 = vector.broadcast %4 : vector<12x1xf32> to vector<12x256xf32>
    %6 = arith.addf %3, %5 : vector<12x256xf32>
    %cst_6 = arith.constant 0.000000e+00 : f32
    %7 = vector.broadcast %cst_6 : f32 to vector<12x256xf32>
    %8 = arith.maximumf %6, %7 : vector<12x256xf32>
    %cst_7 = arith.constant 0.000000e+00 : f32
    %9 = vector.broadcast %cst_7 : f32 to vector<18x18x12xf32>
    %c0_8 = arith.constant 0 : index
    %c0_9 = arith.constant 0 : index
    %c0_10 = arith.constant 0 : index
    %10 = vector.load %arg9[%c0_8, %c0_9, %c0_10] : memref<18x18x12xf32, #tpu.memory_space<vmem>>, vector<18x18x12xf32>
    tpu.vector_store %arg9[%c0_8, %c0_9, %c0_10], %9 {strides = array<i32>} : memref<18x18x12xf32, #tpu.memory_space<vmem>>, vector<18x18x12xf32>,
    %11 = tpu.transpose %8, [1, 0] : vector<12x256xf32> -> vector<256x12xf32>
    %12 = vector.shape_cast %11 : vector<256x12xf32> to vector<16x16x12xf32>
    %c1 = arith.constant 1 : index
    %c1_11 = arith.constant 1 : index
    %c0_12 = arith.constant 0 : index
    %13 = vector.load %arg9[%c1, %c1_11, %c0_12] : memref<18x18x12xf32, #tpu.memory_space<vmem>>, vector<16x16x12xf32>
    tpu.vector_store %arg9[%c1, %c1_11, %c0_12], %12 {strides = array<i32>} : memref<18x18x12xf32, #tpu.memory_space<vmem>>, vector<16x16x12xf32>,
    %c0_13 = arith.constant 0 : index
    %c0_14 = arith.constant 0 : index
    %14 = vector.load %arg4[%c0_13, %c0_14] : memref<9x12xf32, #tpu.memory_space<vmem>>, vector<9x12xf32>
    %cst_15 = arith.constant 0.000000e+00 : f32
    %15 = vector.broadcast %cst_15 : f32 to vector<16x16x12xf32>
    %c0_16 = arith.constant 0 : index
    %c0_17 = arith.constant 0 : index
    %c0_18 = arith.constant 0 : index
    %16 = vector.load %arg9[%c0_16, %c0_17, %c0_18] : memref<18x18x12xf32, #tpu.memory_space<vmem>>, vector<16x16x12xf32>
    %17 = vector.extract_strided_slice %14 {offsets = [0, 0], sizes = [1, 12], strides = [1, 1]} : vector<9x12xf32> to vector<1x12xf32>
    %18 = vector.shape_cast %17 : vector<1x12xf32> to vector<1x1x12xf32>
    %19 = vector.broadcast %18 : vector<1x1x12xf32> to vector<16x16x12xf32>
    %20 = arith.mulf %16, %19 : vector<16x16x12xf32>
    %21 = arith.addf %15, %20 : vector<16x16x12xf32>
    %c0_19 = arith.constant 0 : index
    %c1_20 = arith.constant 1 : index
    %c0_21 = arith.constant 0 : index
    %22 = vector.load %arg9[%c0_19, %c1_20, %c0_21] : memref<18x18x12xf32, #tpu.memory_space<vmem>>, vector<16x16x12xf32>
    %23 = vector.extract_strided_slice %14 {offsets = [1, 0], sizes = [1, 12], strides = [1, 1]} : vector<9x12xf32> to vector<1x12xf32>
    %24 = vector.shape_cast %23 : vector<1x12xf32> to vector<1x1x12xf32>
    %25 = vector.broadcast %24 : vector<1x1x12xf32> to vector<16x16x12xf32>
    %26 = arith.mulf %22, %25 : vector<16x16x12xf32>
    %27 = arith.addf %21, %26 : vector<16x16x12xf32>
    %c0_22 = arith.constant 0 : index
    %c2 = arith.constant 2 : index
    %c0_23 = arith.constant 0 : index
    %28 = vector.load %arg9[%c0_22, %c2, %c0_23] : memref<18x18x12xf32, #tpu.memory_space<vmem>>, vector<16x16x12xf32>
    %29 = vector.extract_strided_slice %14 {offsets = [2, 0], sizes = [1, 12], strides = [1, 1]} : vector<9x12xf32> to vector<1x12xf32>
    %30 = vector.shape_cast %29 : vector<1x12xf32> to vector<1x1x12xf32>
    %31 = vector.broadcast %30 : vector<1x1x12xf32> to vector<16x16x12xf32>
    %32 = arith.mulf %28, %31 : vector<16x16x12xf32>
    %33 = arith.addf %27, %32 : vector<16x16x12xf32>
    %c1_24 = arith.constant 1 : index
    %c0_25 = arith.constant 0 : index
    %c0_26 = arith.constant 0 : index
    %34 = vector.load %arg9[%c1_24, %c0_25, %c0_26] : memref<18x18x12xf32, #tpu.memory_space<vmem>>, vector<16x16x12xf32>
    %35 = vector.extract_strided_slice %14 {offsets = [3, 0], sizes = [1, 12], strides = [1, 1]} : vector<9x12xf32> to vector<1x12xf32>
    %36 = vector.shape_cast %35 : vector<1x12xf32> to vector<1x1x12xf32>
    %37 = vector.broadcast %36 : vector<1x1x12xf32> to vector<16x16x12xf32>
    %38 = arith.mulf %34, %37 : vector<16x16x12xf32>
    %39 = arith.addf %33, %38 : vector<16x16x12xf32>
    %c1_27 = arith.constant 1 : index
    %c1_28 = arith.constant 1 : index
    %c0_29 = arith.constant 0 : index
    %40 = vector.load %arg9[%c1_27, %c1_28, %c0_29] : memref<18x18x12xf32, #tpu.memory_space<vmem>>, vector<16x16x12xf32>
    %41 = vector.extract_strided_slice %14 {offsets = [4, 0], sizes = [1, 12], strides = [1, 1]} : vector<9x12xf32> to vector<1x12xf32>
    %42 = vector.shape_cast %41 : vector<1x12xf32> to vector<1x1x12xf32>
    %43 = vector.broadcast %42 : vector<1x1x12xf32> to vector<16x16x12xf32>
    %44 = arith.mulf %40, %43 : vector<16x16x12xf32>
    %45 = arith.addf %39, %44 : vector<16x16x12xf32>
    %c1_30 = arith.constant 1 : index
    %c2_31 = arith.constant 2 : index
    %c0_32 = arith.constant 0 : index
    %46 = vector.load %arg9[%c1_30, %c2_31, %c0_32] : memref<18x18x12xf32, #tpu.memory_space<vmem>>, vector<16x16x12xf32>
    %47 = vector.extract_strided_slice %14 {offsets = [5, 0], sizes = [1, 12], strides = [1, 1]} : vector<9x12xf32> to vector<1x12xf32>
    %48 = vector.shape_cast %47 : vector<1x12xf32> to vector<1x1x12xf32>
    %49 = vector.broadcast %48 : vector<1x1x12xf32> to vector<16x16x12xf32>
    %50 = arith.mulf %46, %49 : vector<16x16x12xf32>
    %51 = arith.addf %45, %50 : vector<16x16x12xf32>
    %c2_33 = arith.constant 2 : index
    %c0_34 = arith.constant 0 : index
    %c0_35 = arith.constant 0 : index
    %52 = vector.load %arg9[%c2_33, %c0_34, %c0_35] : memref<18x18x12xf32, #tpu.memory_space<vmem>>, vector<16x16x12xf32>
    %53 = vector.extract_strided_slice %14 {offsets = [6, 0], sizes = [1, 12], strides = [1, 1]} : vector<9x12xf32> to vector<1x12xf32>
    %54 = vector.shape_cast %53 : vector<1x12xf32> to vector<1x1x12xf32>
    %55 = vector.broadcast %54 : vector<1x1x12xf32> to vector<16x16x12xf32>
    %56 = arith.mulf %52, %55 : vector<16x16x12xf32>
    %57 = arith.addf %51, %56 : vector<16x16x12xf32>
    %c2_36 = arith.constant 2 : index
    %c1_37 = arith.constant 1 : index
    %c0_38 = arith.constant 0 : index
    %58 = vector.load %arg9[%c2_36, %c1_37, %c0_38] : memref<18x18x12xf32, #tpu.memory_space<vmem>>, vector<16x16x12xf32>
    %59 = vector.extract_strided_slice %14 {offsets = [7, 0], sizes = [1, 12], strides = [1, 1]} : vector<9x12xf32> to vector<1x12xf32>
    %60 = vector.shape_cast %59 : vector<1x12xf32> to vector<1x1x12xf32>
    %61 = vector.broadcast %60 : vector<1x1x12xf32> to vector<16x16x12xf32>
    %62 = arith.mulf %58, %61 : vector<16x16x12xf32>
    %63 = arith.addf %57, %62 : vector<16x16x12xf32>
    %c2_39 = arith.constant 2 : index
    %c2_40 = arith.constant 2 : index
    %c0_41 = arith.constant 0 : index
    %64 = vector.load %arg9[%c2_39, %c2_40, %c0_41] : memref<18x18x12xf32, #tpu.memory_space<vmem>>, vector<16x16x12xf32>
    %65 = vector.extract_strided_slice %14 {offsets = [8, 0], sizes = [1, 12], strides = [1, 1]} : vector<9x12xf32> to vector<1x12xf32>
    %66 = vector.shape_cast %65 : vector<1x12xf32> to vector<1x1x12xf32>
    %67 = vector.broadcast %66 : vector<1x1x12xf32> to vector<16x16x12xf32>
    %68 = arith.mulf %64, %67 : vector<16x16x12xf32>
    %69 = arith.addf %63, %68 : vector<16x16x12xf32>
    %c0_42 = arith.constant 0 : index
    %c0_43 = arith.constant 0 : index
    %70 = vector.load %arg5[%c0_42, %c0_43] : memref<1x12xf32, #tpu.memory_space<vmem>>, vector<1x12xf32>
    %71 = vector.shape_cast %70 : vector<1x12xf32> to vector<1x1x12xf32>
    %72 = vector.broadcast %71 : vector<1x1x12xf32> to vector<16x16x12xf32>
    %73 = arith.addf %69, %72 : vector<16x16x12xf32>
    %cst_44 = arith.constant 0.000000e+00 : f32
    %74 = vector.broadcast %cst_44 : f32 to vector<16x16x12xf32>
    %75 = arith.maximumf %73, %74 : vector<16x16x12xf32>
    %76 = vector.shape_cast %75 : vector<16x16x12xf32> to vector<256x12xf32>
    %c0_45 = arith.constant 0 : index
    %c0_46 = arith.constant 0 : index
    %77 = vector.load %arg6[%c0_45, %c0_46] : memref<4x12xf32, #tpu.memory_space<vmem>>, vector<4x12xf32>
    %cst_47 = arith.constant dense<0.000000e+00> : vector<4x256xf32>
    %78 = tpu.matmul %77, %76, %cst_47 {dimension_numbers = #tpu.dot_dimension_numbers<[1], [1], [0], [0], [0, 0, 1, 0], [], []>} : vector<4x12xf32>, vector<256x12xf32>, vector<4x256xf32> -> vector<4x256xf32>
    %c0_48 = arith.constant 0 : index
    %c0_49 = arith.constant 0 : index
    %79 = vector.load %arg7[%c0_48, %c0_49] : memref<4x1xf32, #tpu.memory_space<vmem>>, vector<4x1xf32>
    %80 = vector.broadcast %79 : vector<4x1xf32> to vector<4x256xf32>
    %81 = arith.addf %78, %80 : vector<4x256xf32>
    %82 = arith.addf %81, %1 : vector<4x256xf32>
    %c0_50 = arith.constant 0 : index
    %c0_51 = arith.constant 0 : index
    %c0_52 = arith.constant 0 : index
    %83 = vector.load %arg8[%c0_50, %c0_51, %c0_52] : memref<1x4x256xf32, #tpu.memory_space<vmem>>, vector<1x4x256xf32>
    %84 = vector.shape_cast %83 : vector<1x4x256xf32> to vector<4x256xf32>
    %85 = vector.shape_cast %82 : vector<4x256xf32> to vector<1x4x256xf32>
    tpu.vector_store %arg8[%c0_50, %c0_51, %c0_52], %85 {strides = array<i32>} : memref<1x4x256xf32, #tpu.memory_space<vmem>>, vector<1x4x256xf32>,
    return
  }
  func.func @transform_0(%arg0: i32) -> (i32, i32, i32) {
    %c0_i32 = arith.constant 0 : i32
    %c0_i32_0 = arith.constant 0 : i32
    %c0_i32_1 = arith.constant 0 : i32
    return %arg0, %c0_i32, %c0_i32_0 : i32, i32, i32
  }
  func.func @transform_1(%arg0: i32) -> (i32, i32) {
    %c0_i32 = arith.constant 0 : i32
    %c0_i32_0 = arith.constant 0 : i32
    %c0_i32_1 = arith.constant 0 : i32
    return %c0_i32, %c0_i32_0 : i32, i32
  }
  func.func @transform_2(%arg0: i32) -> (i32, i32) {
    %c0_i32 = arith.constant 0 : i32
    %c0_i32_0 = arith.constant 0 : i32
    %c0_i32_1 = arith.constant 0 : i32
    return %c0_i32, %c0_i32_0 : i32, i32
  }
  func.func @transform_3(%arg0: i32) -> (i32, i32) {
    %c0_i32 = arith.constant 0 : i32
    %c0_i32_0 = arith.constant 0 : i32
    %c0_i32_1 = arith.constant 0 : i32
    return %c0_i32, %c0_i32_0 : i32, i32
  }
  func.func @transform_4(%arg0: i32) -> (i32, i32) {
    %c0_i32 = arith.constant 0 : i32
    %c0_i32_0 = arith.constant 0 : i32
    %c0_i32_1 = arith.constant 0 : i32
    return %c0_i32, %c0_i32_0 : i32, i32
  }
  func.func @transform_5(%arg0: i32) -> (i32, i32) {
    %c0_i32 = arith.constant 0 : i32
    %c0_i32_0 = arith.constant 0 : i32
    %c0_i32_1 = arith.constant 0 : i32
    return %c0_i32, %c0_i32_0 : i32, i32
  }
  func.func @transform_6(%arg0: i32) -> (i32, i32) {
    %c0_i32 = arith.constant 0 : i32
    %c0_i32_0 = arith.constant 0 : i32
    %c0_i32_1 = arith.constant 0 : i32
    return %c0_i32, %c0_i32_0 : i32, i32
  }
  func.func @transform_7(%arg0: i32) -> (i32, i32, i32) {
    %c0_i32 = arith.constant 0 : i32
    %c0_i32_0 = arith.constant 0 : i32
    %c0_i32_1 = arith.constant 0 : i32
    return %arg0, %c0_i32, %c0_i32_0 : i32, i32, i32
  }
}

</mosaic_0001>

<bundles_post_ra>
// kernel: tpu_custom_call.1
= control target key start
LH: loop header
LB: loop body
LE: loop exit
PB: predicated region body
PF: predicated region fallthrough
CT: control target
= control target key end

     0   :  { %12 = vsyncpa [#allocation4], 0  ;;  %s3206_s0 = inlined_call_operand.vmem [shape: f32[2,4,256], index: 0, kind: input, shape index: {}]   ;;  %s3207_s1 = inlined_call_operand.vmem [shape: f32[12,4], index: 1, kind: input, shape index: {}]   ;;  %s3208_s2 = inlined_call_operand.vmem [shape: f32[12,1], index: 2, kind: input, shape index: {}]   ;;  %s3209_s3 = inlined_call_operand.vmem [shape: f32[9,12], index: 3, kind: input, shape index: {}]   ;;  %s3210_s4 = inlined_call_operand.vmem [shape: f32[1,12], index: 4, kind: input, shape index: {}]   ;;  %s3211_s5 = inlined_call_operand.vmem [shape: f32[4,12], index: 5, kind: input, shape index: {}]   ;;  %s3212_s6 = inlined_call_operand.vmem [shape: f32[4,1], index: 6, kind: input, shape index: {}]   ;;  %s3213_s7 = inlined_call_operand.hbm [shape: f32[2,4,256], index: 7, kind: output, shape index: {}]  }
   0x1   :  { %14 = vsyncpa [#allocation4 + $0x1], 0  ;;  %s2063_s24 = smov 0   ;;  %s2065_s25 = smov 0  }
   0x2   :  { %s2067_s26 = smov 0   ;;  %s2069_s27 = smov 0  }
   0x3 LB: > { %s2084_s28 = sadd.s32 4294967295, %s2018_s27   ;;  %s1773_s29 = sadd.s32 4294967294, %s2018_s27   ;;  %s2018_s27 = sphi %s2069_s27, %s3260_s27   ;;  %s2014_s26 = sphi %s2067_s26, %s3259_s26   ;;  %s2010_s25 = sphi %s2065_s25, %s3258_s25   ;;  %s2006_s24 = sphi %s2063_s24, %s3257_s24  }
   0x4   : > { %s2088_s30 = sadd.s32 1, %s2018_s27   ;;  %s179_s8 = sadd.s32 1, %s2014_s26 }
   0x5   : > { %s176_s9 = ssub.s32 %s2018_s27, %s2088_s30  ;;  %p189_p0 = scmp.ne.s32.totalorder %s2014_s26, %s2010_s25 }
   0x6   : > { %p177_p1 = scmp.eq.s32.totalorder %s176_s9, 0  ;;  %p190_p2 = scmp.eq.s32.totalorder %s2084_s28, 1 }
   0x7   : > { %p195_p3 = scmp.ne.s32.totalorder %s2010_s25, %s2006_s24  ;;  %p196_p4 = scmp.eq.s32.totalorder %s1773_s29, 1 }
   0x8   : > { %s2099_s10 = scalar_select %p177_p1, %s2014_s26, %s179_s8  }
   0x9   : > { %p2101_p5 = por %p190_p2, %p189_p0  ;;  %p2105_p6 = por %p196_p4, %p195_p3 }
   0xa   : > { %p1776_p7 = scmp.ge.s32.totalorder %s2018_s27, 1  ;;  %p240_p8 = scmp.lt.s32.totalorder %s2018_s27, 3 }
   0xc   : > { %p241_p9 = pnand %p1776_p7, %p240_p8 }
   0xe   : > { %244 = sbr.rel (%p241_p9) target bundleno = 793 (0x319), region = 48 }
  0x15   : > { %p272_p10 = scmp.lt.s32.totalorder %s2084_s28, 1  ;;  %v2020_v0 = vmov 0.0   ;;  %v2021_v1 = vmov 0   ;;  %v280_v2 = vld [vmem:[%s3208_s2] sm:$0xff]  ;;  %v281_v3 = vld [vmem:[%s3208_s2 + $0x8] sm:$0xf]  ;;  %v574_v22 = vlaneseq }
  0x16   : > { %370 = vmatprep.mubr.f32.mxu0 %v2020_v0  ;;  %1949 = vset.pattern.permute.xlu0 %v2021_v1  ;;  %vm301_vm0 = vcmask 1043456   ;;  %v278_v6 = vld [vmem:[%s3207_s1] sm:$0xff]  ;;  %vm294_vm1 = vcmask 31744   ;;  %v279_v7 = vld [vmem:[%s3207_s1 + $0x8] sm:$0xf]  ;;  %vm387_vm2 = vcmask 97280  }
  0x17   : > { %s273_s15 = scalar_select %p272_p10, %s2084_s28, 1  ;;  %284 = vperm.xlu0 %1949, %v280_v2   ;;  %392 = vst.msk [vmem:[#allocation2 + $0x18] sm:$0xff] %vm387_vm2, %v2020_v0  ;;  %393 = vst.msk [vmem:[#allocation2 + $0x20] sm:$0xff] %vm387_vm2, %v2020_v0  ;;  %vm390_vm3 = vcmask 91136   ;;  %v575_v23 = vshrl.u32 %v574_v22, 7  ;;  %v540_v26 = vld [vmem:[%s3209_s3] sm:$0xff] }
  0x18   : > { %388 = vst.msk [vmem:[#allocation2] sm:$0xff] %vm387_vm2, %v2020_v0  ;;  %389 = vst.msk [vmem:[#allocation2 + $0x8] sm:$0xff] %vm387_vm2, %v2020_v0  ;;  %s1825_s17 = sshll.u32 %s2084_s28, 7  ;;  %s2022_s28 = smov [#allocation3]  }
  0x19   : > { %s1824_s18 = sshll.u32 %s273_s15, 3  ;;  %395 = vst.msk [vmem:[#allocation2 + $0x30] sm:$0xff] %vm387_vm2, %v2020_v0  ;;  %396 = vst.msk [vmem:[#allocation2 + $0x38] sm:$0xff] %vm387_vm2, %v2020_v0  ;;  %v576_v24 = vsub.s32 0, %v575_v23  ;;  %v676_v25 = vsub.s32 1, %v575_v23  ;;  %v776_v29 = vsub.s32 2, %v575_v23  ;;  %s3164_s23 = scalar_lea.hbm %s3213_s7, %s1825_s17 }
  0x1a   : > { %s2124_s21 = scalar_lea.vmem %s3206_s0, %s1824_s18  ;;  %398 = vst.msk [vmem:[#allocation2 + $0x48] sm:$0xff] %vm387_vm2, %v2020_v0  ;;  %399 = vst.msk [vmem:[#allocation2 + $0x50] sm:$0xff] %vm387_vm2, %v2020_v0  ;;  %v876_v40 = vsub.s32 3, %v575_v23  ;;  %v976_v43 = vsub.s32 4, %v575_v23  ;;  %v1076_v50 = vsub.s32 5, %v575_v23  ;;  %v1177_v54 = vsub.s32 6, %v575_v23 }
  0x1b   : > { %v277_v4 = vld [vmem:[%s2124_s21] sm:$0xff]  ;;  %289 = vperm.xlu0 %1949, %v281_v3   ;;  %401 = vst.msk [vmem:[#allocation2 + $0x60] sm:$0xff] %vm387_vm2, %v2020_v0  ;;  %402 = vst.msk [vmem:[#allocation2 + $0x68] sm:$0xff] %vm387_vm2, %v2020_v0  ;;  %v2249_v27 = vrot.slane %v540_v26, %v576_v24  ;;  %v2251_v28 = vrot.slane %v540_v26, %v676_v25  ;;  %v2253_v32 = vrot.slane %v540_v26, %v776_v29  ;;  %s269_s15 = sand.u32 1, %s2010_s25   ;;  %s1960_s8 = sshll.u32 %s2022_s28, 4  ;;  %s1961_s8 = int_to_ptr.vmem [resolvable:$false] %s1960_s8 }
  0x1c   : > { %v2127_v5 = vcombine.high %v277_v4, %v277_v4  ;;  %404 = vst.msk [vmem:[#allocation2 + $0x78] sm:$0xff] %vm387_vm2, %v2020_v0  ;;  %405 = vst.msk [vmem:[#allocation2 + $0x80] sm:$0xff] %vm387_vm2, %v2020_v0  ;;  %v2263_v49 = vrot.slane %v540_v26, %v876_v40  ;;  %v2267_v53 = vrot.slane %v540_v26, %v976_v43  ;;  %v1277_v55 = vsub.s32 7, %v575_v23  ;;  %s1777_s16 = sshll.u32 %s269_s15, 3  ;;  %s1700_s29 = scalar_lea.sflag [#allocation4], %s269_s15 }
  0x1d   : > { %407 = vst.msk [vmem:[#allocation2 + $0x90] sm:$0xff] %vm387_vm2, %v2020_v0  ;;  %408 = vst.msk [vmem:[#allocation2 + $0x98] sm:$0xff] %vm387_vm2, %v2020_v0  ;;  %v2270_v63 = vrot.slane %v540_v26, %v1076_v50  ;;  %s271_s18 = scalar_lea.vmem [#allocation3], %s1777_s16  ;;  %s1962_s9 = scalar_lea.vmem %s1961_s8, 256 }
  0x1e   : > { %3225 = vst [vmem:[#allocation6_spill] sm:$0xff] %v2127_v5  ;;  %1780 = vmatprep.subr.msk.mxu0 %vm301_vm0, %v2127_v5  ;;  %410 = vst.msk [vmem:[#allocation2 + $0xa8] sm:$0xff] %vm387_vm2, %v2020_v0  ;;  %s1714_s19 = sshll.u32 %s271_s18, 4  ;;  %s3166_s19 = int_to_ptr.vmem [resolvable:$true] %s1714_s19 }
  0x1f   : > { %1781 = vmatpush1.msk.msra.mxu0 %vm301_vm0, %v277_v4  ;;  %411 = vst.msk [vmem:[#allocation2 + $0xb0] sm:$0xff] %vm387_vm2, %v2020_v0  ;;  %413 = vst.msk [vmem:[#allocation2 + $0xc0] sm:$0xff] %vm387_vm2, %v2020_v0  ;;  %v542_v30 = vld [vmem:[#allocation2] sm:$0xff]  ;;  %v543_v33 = vld [vmem:[#allocation2 + $0x8] sm:$0xff]  ;;  %p1963_p0 = scmp.lt.s32.totalorder %s3166_s19, %s1961_s8 }
  0x20   : > { %1782 = vmatmul.mubr.msk.f32.vlgmr.msra.gmra.mrb[0].mxu0 %vm294_vm1, %v278_v6  ;;  %414 = vst.msk [vmem:[#allocation2 + $0xc8] sm:$0xff] %vm387_vm2, %v2020_v0  ;;  %416 = vst.msk [vmem:[#allocation2 + $0xd8] sm:$0xff] %vm387_vm2, %v2020_v0  ;;  %v642_v31 = vld [vmem:[#allocation2 + $0x1] sm:$0xff]  ;;  %v578_v34 = vmul.f32 %v2249_v27, %v542_v30  ;;  %v579_v41 = vmul.f32 %v2249_v27, %v543_v33 }
  0x21   : > { %376 = vmatprep.mubr.f32.mxu0 %v2020_v0  ;;  %417 = vst.msk [vmem:[#allocation2 + $0xe0] sm:$0xff] %vm387_vm2, %v2020_v0  ;;  %419 = vst.msk [vmem:[#allocation2 + $0xf0] sm:$0xff] %vm387_vm2, %v2020_v0  ;;  %v678_v36 = vmul.f32 %v2251_v28, %v642_v31  ;;  %v742_v38 = vld [vmem:[#allocation2 + $0x2] sm:$0xff] }
  0x22   : > { %420 = vst.msk [vmem:[#allocation2 + $0xf8] sm:$0xff] %vm387_vm2, %v2020_v0  ;;  %422 = vst.msk [vmem:[#allocation2 + $0x108] sm:$0xff] %vm387_vm2, %v2020_v0  ;;  %v778_v46 = vmul.f32 %v2253_v32, %v742_v38 }
  0x23   : > { %423 = vst.msk [vmem:[#allocation2 + $0x110] sm:$0xff] %vm387_vm2, %v2020_v0  ;;  %425 = vst.msk [vmem:[#allocation2 + $0x120] sm:$0xff] %vm387_vm2, %v2020_v0  ;;  %v710_v44 = vadd.f32 %v678_v36, %v578_v34 }
  0x24   : > { %1783 = vmatmul.mubr.msk.f32.gmra.mrb[2].mxu0 %vm294_vm1, %v279_v7  ;;  %426 = vst.msk [vmem:[#allocation2 + $0x128] sm:$0xff] %vm387_vm2, %v2020_v0  ;;  %428 = vst.msk [vmem:[#allocation2 + $0x138] sm:$0xff] %vm387_vm2, %v2020_v0  ;;  %v2278_v7 = vrot.slane %v540_v26, %v1177_v54 }
  0x25   : > { %429 = vst.msk [vmem:[#allocation2 + $0x140] sm:$0xff] %vm387_vm2, %v2020_v0  ;;  %431 = vst.msk [vmem:[#allocation2 + $0x150] sm:$0xff] %vm387_vm2, %v2020_v0  ;;  %v810_v56 = vadd.f32 %v778_v46, %v710_v44 }
  0x26   : > { %432 = vst.msk [vmem:[#allocation2 + $0x158] sm:$0xff] %vm387_vm2, %v2020_v0  ;;  %434 = vst.msk [vmem:[#allocation2 + $0x168] sm:$0xff] %vm387_vm2, %v2020_v0 }
  0x27   : > { %435 = vst.msk [vmem:[#allocation2 + $0x170] sm:$0xff] %vm387_vm2, %v2020_v0  ;;  %437 = vst.msk [vmem:[#allocation2 + $0x180] sm:$0xff] %vm387_vm2, %v2020_v0 }
  0x28   : > { %438 = vst.msk [vmem:[#allocation2 + $0x188] sm:$0xff] %vm387_vm2, %v2020_v0  ;;  %440 = vst.msk [vmem:[#allocation2 + $0x198] sm:$0xff] %vm387_vm2, %v2020_v0 }
  0x29   : > { %441 = vst.msk [vmem:[#allocation2 + $0x1a0] sm:$0xff] %vm387_vm2, %v2020_v0  ;;  %vm2769_vm4 = vmpackc.low %vm387_vm2, %vm387_vm2 }
  0x2a   : > { %394 = vst.msk [vmem:[#allocation2 + $0x28] sm:$0x3] %vm390_vm3, %v2020_v0  ;;  %391 = vst.msk [vmem:[#allocation2 + $0x10] sm:$0x3] %vm390_vm3, %v2020_v0 }
  0x2b   : > { %397 = vst.msk [vmem:[#allocation2 + $0x40] sm:$0x3] %vm390_vm3, %v2020_v0  ;;  %400 = vst.msk [vmem:[#allocation2 + $0x58] sm:$0x3] %vm390_vm3, %v2020_v0 }
  0x2c   : > { %403 = vst.msk [vmem:[#allocation2 + $0x70] sm:$0x3] %vm390_vm3, %v2020_v0  ;;  %406 = vst.msk [vmem:[#allocation2 + $0x88] sm:$0x3] %vm390_vm3, %v2020_v0 }
  0x2d   : > { %409 = vst.msk [vmem:[#allocation2 + $0xa0] sm:$0x3] %vm390_vm3, %v2020_v0  ;;  %412 = vst.msk [vmem:[#allocation2 + $0xb8] sm:$0x3] %vm390_vm3, %v2020_v0 }
  0x2e   : > { %415 = vst.msk [vmem:[#allocation2 + $0xd0] sm:$0x3] %vm390_vm3, %v2020_v0  ;;  %418 = vst.msk [vmem:[#allocation2 + $0xe8] sm:$0x3] %vm390_vm3, %v2020_v0 }
  0x2f   : > { %421 = vst.msk [vmem:[#allocation2 + $0x100] sm:$0x3] %vm390_vm3, %v2020_v0  ;;  %424 = vst.msk [vmem:[#allocation2 + $0x118] sm:$0x3] %vm390_vm3, %v2020_v0 }
  0x30   : > { %427 = vst.msk [vmem:[#allocation2 + $0x130] sm:$0x3] %vm390_vm3, %v2020_v0  ;;  %430 = vst.msk [vmem:[#allocation2 + $0x148] sm:$0x3] %vm390_vm3, %v2020_v0 }
  0x31   : > { %433 = vst.msk [vmem:[#allocation2 + $0x160] sm:$0x3] %vm390_vm3, %v2020_v0  ;;  %436 = vst.msk [vmem:[#allocation2 + $0x178] sm:$0x3] %vm390_vm3, %v2020_v0  ;;  %v643_v35 = vld [vmem:[#allocation2 + $0x9] sm:$0xff] }
  0x32   : > { %439 = vst.msk [vmem:[#allocation2 + $0x190] sm:$0x3] %vm390_vm3, %v2020_v0  ;;  %442 = vst.msk [vmem:[#allocation2 + $0x1a8] sm:$0x3] %vm390_vm3, %v2020_v0  ;;  %v679_v42 = vmul.f32 %v2251_v28, %v643_v35  ;;  %v743_v45 = vld [vmem:[#allocation2 + $0xa] sm:$0xff] }
  0x33   : > { %v779_v52 = vmul.f32 %v2253_v32, %v743_v45 }
  0x34   : > { %v711_v51 = vadd.f32 %v679_v42, %v579_v41 }
  0x36   : > { %v811_v3 = vadd.f32 %v779_v52, %v711_v51 }
  0x96   : > { %v285_v8 = vpop.permute.xlu0 %284 }
  0x9a   : > { %v290_v14 = vpop.permute.xlu0 %289 }
  0xf3   : > { %v372_v9 = vpop.f32.mrb[0].mxu0 }
  0xf4   : > { %v374_v10 = vpop.f32.mrb[1].mxu0  ;;  %v373_v11 = vadd.f32 %v372_v9, %v285_v8 }
  0xf5   : > { %v375_v12 = vadd.f32 %v374_v10, %v285_v8  ;;  %v2280_v8 = vrot.slane %v540_v26, %v1277_v55 }
  0xf6   : > { %v383_v13 = vmax.f32 %v373_v11, 0.0 }
  0xf7   : > { %v384_v15 = vmax.f32 %v375_v12, 0.0  ;;  %v378_v16 = vpop.f32.mrb[2].mxu0 }
  0xf8   : > { %v379_v17 = vadd.f32 %v378_v16, %v290_v14  ;;  %v380_v18 = vpop.f32.mrb[3].mxu0  ;;  %443 = vxpose.xlu1.b32.start [1/2] (short) %v383_v13, 128 }
  0xf9   : > { %v381_v19 = vadd.f32 %v380_v18, %v290_v14  ;;  %475 = vxpose.xlu0.b32.start [1/2] (short) %v384_v15, 128 }
  0xfa   : > { %v385_v20 = vmax.f32 %v379_v17, 0.0 }
  0xfb   : > { %v386_v21 = vmax.f32 %v381_v19, 0.0 }
  0xfc   : > { %444 = vxpose.xlu1.b32.end [2/2] (short) %v385_v20, 128 }
  0xfd   : > { %476 = vxpose.xlu0.b32.end [2/2] (short) %v386_v21, 128 }
 0x11a   : > { %1950 = vset.pattern.permute.xlu1 %v2021_v1 }
 0x178   : > { %v459_v37 = vpop.trf.xlu1 }
 0x179   : > { %508 = vst.msk [vmem:[#allocation2 + $0x19] sm:$0xff] %vm387_vm2, %v459_v37  ;;  %v491_v39 = vpop.trf.xlu0 }
 0x17a   : > { %524 = vst.msk [vmem:[#allocation2 + $0xd9] sm:$0xff] %vm387_vm2, %v491_v39 }
 0x17c   : > { %v460_v47 = vpop.trf.xlu1 }
 0x17d   : > { %509 = vst.msk [vmem:[#allocation2 + $0x21] sm:$0xff] %vm387_vm2, %v460_v47  ;;  %v492_v48 = vpop.trf.xlu0 }
 0x17e   : > { %525 = vst.msk [vmem:[#allocation2 + $0xe1] sm:$0xff] %vm387_vm2, %v492_v48 }
 0x180   : > { %v461_v57 = vpop.trf.xlu1  ;;  %v842_v58 = vld [vmem:[#allocation2 + $0x18] sm:$0xff] }
 0x181   : > { %v942_v59 = vld [vmem:[#allocation2 + $0x19] sm:$0xff]  ;;  %510 = vst.msk [vmem:[#allocation2 + $0x31] sm:$0xff] %vm387_vm2, %v461_v57  ;;  %v493_v60 = vpop.trf.xlu0  ;;  %v878_v0 = vmul.f32 %v2263_v49, %v842_v58  ;;  %v580_v1 = vmul.f32 %v842_v58, %v2249_v27 }
 0x182   : > { %v858_v61 = vld [vmem:[#allocation2 + $0xd8] sm:$0xff]  ;;  %v680_v2 = vmul.f32 %v942_v59, %v2251_v28  ;;  %526 = vst.msk [vmem:[#allocation2 + $0xf1] sm:$0xff] %vm387_vm2, %v493_v60  ;;  %v978_v10 = vmul.f32 %v2267_v53, %v942_v59 }
 0x183   : > { %v958_v62 = vld [vmem:[#allocation2 + $0xd9] sm:$0xff]  ;;  %v596_v4 = vmul.f32 %v858_v61, %v2249_v27  ;;  %v910_v9 = vadd.f32 %v878_v0, %v810_v56  ;;  %v2284_v12 = vmul.f32 %v2263_v49, %v858_v61  ;;  %v2332_v56 = vld [vmem:[%s3209_s3 + $0x8] ss:$0 sm:$0xff] }
 0x184   : > { %v696_v6 = vmul.f32 %v958_v62, %v2251_v28  ;;  %v462_v11 = vpop.trf.xlu1  ;;  %v2287_v13 = vmul.f32 %v2267_v53, %v958_v62  ;;  %v843_v14 = vld [vmem:[#allocation2 + $0x20] sm:$0xff]  ;;  %v2289_v18 = vadd.f32 %v680_v2, %v580_v1 }
 0x185   : > { %v943_v15 = vld [vmem:[#allocation2 + $0x21] sm:$0xff]  ;;  %511 = vst.msk [vmem:[#allocation2 + $0x39] sm:$0xff] %vm387_vm2, %v462_v11  ;;  %v494_v19 = vpop.trf.xlu0  ;;  %v879_v23 = vmul.f32 %v2263_v49, %v843_v14  ;;  %v1010_v25 = vadd.f32 %v978_v10, %v910_v9  ;;  %v581_v46 = vmul.f32 %v843_v14, %v2249_v27 }
 0x186   : > { %v1042_v16 = vld [vmem:[#allocation2 + $0x1a] sm:$0xff]  ;;  %v728_v17 = vadd.f32 %v696_v6, %v596_v4  ;;  %v979_v24 = vmul.f32 %v2267_v53, %v943_v15  ;;  %527 = vst.msk [vmem:[#allocation2 + $0xf9] sm:$0xff] %vm387_vm2, %v494_v19  ;;  %v1059_v31 = vld [vmem:[#allocation2 + $0xe2] sm:$0xff]  ;;  %v681_v55 = vmul.f32 %v943_v15, %v2251_v28 }
 0x187   : > { %v859_v20 = vld [vmem:[#allocation2 + $0xe0] sm:$0xff]  ;;  %v1078_v26 = vmul.f32 %v2270_v63, %v1042_v16  ;;  %v2307_v36 = vmul.f32 %v2270_v63, %v1059_v31  ;;  %v911_v37 = vadd.f32 %v879_v23, %v811_v3  ;;  %v797_v45 = vmul.f32 %v1059_v31, %v2253_v32 }
 0x188   : > { %v959_v21 = vld [vmem:[#allocation2 + $0xe1] sm:$0xff]  ;;  %v2297_v29 = vmul.f32 %v2263_v49, %v859_v20  ;;  %v597_v35 = vmul.f32 %v859_v20, %v2249_v27  ;;  %v463_v40 = vpop.trf.xlu1  ;;  %v2310_v41 = vld [vmem:[#allocation2 + $0x30] sm:$0xff]  ;;  %v713_v10 = vadd.f32 %v681_v55, %v581_v46  ;;  %v780_v11 = vmul.f32 %v1042_v16, %v2253_v32 }
 0x189   : > { %v1058_v22 = vld [vmem:[#allocation2 + $0xda] sm:$0xff]  ;;  %v2300_v30 = vmul.f32 %v2267_v53, %v959_v21  ;;  %v1043_v34 = vld [vmem:[#allocation2 + $0x22] sm:$0xff]  ;;  %v1110_v39 = vadd.f32 %v1078_v26, %v1010_v25  ;;  %v2312_v42 = vld [vmem:[#allocation2 + $0x31] sm:$0xff]  ;;  %v697_v43 = vmul.f32 %v959_v21, %v2251_v28  ;;  %512 = vst.msk [vmem:[#allocation2 + $0x49] sm:$0xff] %vm387_vm2, %v463_v40  ;;  %v495_v47 = vpop.trf.xlu0  ;;  %v1011_v51 = vadd.f32 %v979_v24, %v911_v37 }
 0x18a   : > { %v2303_v33 = vmul.f32 %v2270_v63, %v1058_v22  ;;  %v1079_v38 = vmul.f32 %v2270_v63, %v1043_v34  ;;  %v796_v44 = vmul.f32 %v1058_v22, %v2253_v32  ;;  %v2319_v48 = vld [vmem:[#allocation2 + $0xf0] sm:$0xff]  ;;  %v1179_v52 = vmul.f32 %v2278_v7, %v2310_v41  ;;  %528 = vst.msk [vmem:[#allocation2 + $0x109] sm:$0xff] %vm387_vm2, %v495_v47 }
 0x18b   : > { %v2321_v50 = vld [vmem:[#allocation2 + $0xf1] sm:$0xff]  ;;  %v1279_v54 = vmul.f32 %v2280_v8, %v2312_v42  ;;  %v2336_v57 = vmul.f32 %v2278_v7, %v2319_v48  ;;  %v729_v59 = vadd.f32 %v697_v43, %v597_v35  ;;  %v896_v0 = vmul.f32 %v2319_v48, %v2263_v49 }
 0x18c   : > { %v2340_v58 = vmul.f32 %v2280_v8, %v2321_v50  ;;  %v828_v60 = vadd.f32 %v796_v44, %v728_v17  ;;  %v1111_v61 = vadd.f32 %v1079_v38, %v1011_v51  ;;  %v1211_v62 = vadd.f32 %v1179_v52, %v1110_v39  ;;  %v464_v2 = vpop.trf.xlu1  ;;  %v2346_v3 = vld [vmem:[#allocation2 + $0x38] sm:$0xff] }
 0x18d   : > { %3226 = vst [vmem:[#allocation7_spill] sm:$0xff] %v2336_v57  ;;  %v996_v1 = vmul.f32 %v2321_v50, %v2267_v53  ;;  %v2348_v4 = vld [vmem:[#allocation2 + $0x39] sm:$0xff]  ;;  %v829_v9 = vadd.f32 %v797_v45, %v729_v59  ;;  %v781_v14 = vmul.f32 %v1043_v34, %v2253_v32  ;;  %513 = vst.msk [vmem:[#allocation2 + $0x51] sm:$0xff] %vm387_vm2, %v464_v2  ;;  %v496_v15 = vpop.trf.xlu0 }
 0x18e   : > { %3227 = vst [vmem:[#allocation8_spill] sm:$0xff] %v2340_v58  ;;  %v2350_v6 = vld [vmem:[#allocation2 + $0x32] sm:$0xff]  ;;  %v1180_v21 = vmul.f32 %v2278_v7, %v2346_v3  ;;  %v1280_v22 = vmul.f32 %v2280_v8, %v2348_v4  ;;  %v1311_v23 = vadd.f32 %v1279_v54, %v1211_v62  ;;  %529 = vst.msk [vmem:[#allocation2 + $0x111] sm:$0xff] %vm387_vm2, %v496_v15  ;;  %v2376_v26 = vld [vmem:[#allocation2 + $0xfa] sm:$0xff] }
 0x18f   : > { %v2355_v17 = vld [vmem:[#allocation2 + $0xf8] sm:$0xff]  ;;  %v1379_v16 = vmul.f32 %v2332_v56, %v2350_v6  ;;  %v2385_v34 = vld [vmem:[%s3210_s4] ss:$0 sm:$0xff]  ;;  %v2393_v38 = vmul.f32 %v2332_v56, %v2376_v26  ;;  %v928_v45 = vadd.f32 %v896_v0, %v828_v60  ;;  %v1097_v59 = vmul.f32 %v2376_v26, %v2270_v63 }
 0x190   : > { %v2357_v19 = vld [vmem:[#allocation2 + $0xf9] sm:$0xff]  ;;  %v2370_v24 = vmul.f32 %v2278_v7, %v2355_v17  ;;  %v897_v37 = vmul.f32 %v2355_v17, %v2263_v49  ;;  %v1212_v39 = vadd.f32 %v1180_v21, %v1111_v61  ;;  %v465_v44 = vpop.trf.xlu1  ;;  %v812_v60 = vadd.f32 %v780_v11, %v2289_v18  ;;  %v2421_v11 = vld [vmem:[#allocation2 + $0x48] sm:$0xff] }
 0x191   : > { %v2359_v20 = vld [vmem:[#allocation2 + $0xf2] sm:$0xff]  ;;  %v2374_v25 = vmul.f32 %v2280_v8, %v2357_v19  ;;  %v2387_v35 = vld [vmem:[#allocation2 + $0x3a] sm:$0xff]  ;;  %3231 = vst [vmem:[#allocation12_spill] sm:$0xff] %v2393_v38  ;;  %v1411_v43 = vadd.f32 %v1379_v16, %v1311_v23  ;;  %v997_v47 = vmul.f32 %v2357_v19, %v2267_v53  ;;  %514 = vst.msk [vmem:[#allocation2 + $0x61] sm:$0xff] %vm387_vm2, %v465_v44  ;;  %v497_v52 = vpop.trf.xlu0 }
 0x192   : > { %3228 = vst [vmem:[#allocation9_spill] sm:$0xff] %v2370_v24  ;;  %v2380_v31 = vmul.f32 %v2332_v56, %v2359_v20  ;;  %v1380_v40 = vmul.f32 %v2332_v56, %v2387_v35  ;;  %v929_v46 = vadd.f32 %v897_v37, %v829_v9  ;;  %v1096_v51 = vmul.f32 %v2359_v20, %v2270_v63  ;;  %v2405_v61 = vld [vmem:[#allocation2 + $0x108] sm:$0xff] }
 0x193   : > { %3229 = vst [vmem:[#allocation10_spill] sm:$0xff] %v2374_v25  ;;  %v1312_v54 = vadd.f32 %v1280_v22, %v1212_v39  ;;  %v1450_v55 = vadd.f32 %v2385_v34, %v1411_v43  ;;  %v2407_v62 = vld [vmem:[#allocation2 + $0x109] sm:$0xff]  ;;  %530 = vst.msk [vmem:[#allocation2 + $0x121] sm:$0xff] %vm387_vm2, %v497_v52  ;;  %v1028_v0 = vadd.f32 %v996_v1, %v928_v45 }
 0x194   : > { %3230 = vst [vmem:[#allocation11_spill] sm:$0xff] %v2380_v31  ;;  %v1029_v2 = vadd.f32 %v997_v47, %v929_v46  ;;  %v1197_v9 = vmul.f32 %v2278_v7, %v2405_v61  ;;  %v1297_v15 = vmul.f32 %v2280_v8, %v2407_v62  ;;  %v813_v23 = vadd.f32 %v781_v14, %v713_v10  ;;  %v466_v37 = vpop.trf.xlu1  ;;  %v2450_v5 = vld [vmem:[#allocation2 + $0x51] sm:$0xff] }
 0x195   : > { %v1412_v21 = vadd.f32 %v1380_v40, %v1312_v54  ;;  %v1482_v22 = vmax.f32 %v1450_v55, 0.0  ;;  %v880_v16 = vmul.f32 %v2310_v41, %v2263_v49  ;;  %v1128_v39 = vadd.f32 %v1096_v51, %v1028_v0  ;;  %515 = vst.msk [vmem:[#allocation2 + $0x69] sm:$0xff] %vm387_vm2, %v466_v37  ;;  %v498_v44 = vpop.trf.xlu0  ;;  %v2425_v10 = vld [vmem:[#allocation2 + $0x110] sm:$0xff] }
 0x196   : > { %v1129_v43 = vadd.f32 %v1097_v59, %v1029_v2  ;;  %v881_v18 = vmul.f32 %v2346_v3, %v2263_v49  ;;  %v980_v1 = vmul.f32 %v2312_v42, %v2267_v53  ;;  %v2427_v14 = vld [vmem:[#allocation2 + $0x111] sm:$0xff]  ;;  %v981_v47 = vmul.f32 %v2348_v4, %v2267_v53  ;;  %531 = vst.msk [vmem:[#allocation2 + $0x129] sm:$0xff] %vm387_vm2, %v498_v44  ;;  %v2448_v44 = vld [vmem:[#allocation2 + $0x49] sm:$0xff] }
 0x197   : > { %v1451_v40 = vadd.f32 %v2385_v34, %v1412_v21  ;;  %v2429_v45 = vld [vmem:[#allocation2 + $0x10a] sm:$0xff]  ;;  %v912_v46 = vadd.f32 %v880_v16, %v812_v60  ;;  %v1080_v51 = vmul.f32 %v2350_v6, %v2270_v63  ;;  %v1198_v52 = vmul.f32 %v2278_v7, %v2425_v10  ;;  %v2440_v59 = vld [vmem:[#allocation2 + $0x112] sm:$0xff] }
 0x198   : > { %v1229_v54 = vadd.f32 %v1197_v9, %v1128_v39  ;;  %v1298_v55 = vmul.f32 %v2280_v8, %v2427_v14  ;;  %v1397_v60 = vmul.f32 %v2332_v56, %v2429_v45  ;;  %v2444_v0 = vld [vmem:[#allocation2 + $0x50] sm:$0xff]  ;;  %v1398_v21 = vmul.f32 %v2332_v56, %v2440_v59  ;;  %v467_v9 = vpop.trf.xlu1 }
 0x199   : > { %v1483_v2 = vmax.f32 %v1451_v40, 0.0  ;;  %v913_v16 = vadd.f32 %v881_v18, %v813_v23  ;;  %v1012_v37 = vadd.f32 %v980_v1, %v912_v46  ;;  %v1230_v39 = vadd.f32 %v1198_v52, %v1129_v43  ;;  %v2456_v58 = vld [vmem:[#allocation2 + $0x4a] sm:$0xff]  ;;  %v2458_v40 = vld [vmem:[#allocation2 + $0x52] sm:$0xff]  ;;  %516 = vst.msk [vmem:[#allocation2 + $0x79] sm:$0xff] %vm387_vm2, %v467_v9  ;;  %v499_v23 = vpop.trf.xlu0 }
 0x19a   : > { %v1329_v38 = vadd.f32 %v1297_v15, %v1229_v54  ;;  %v1081_v31 = vmul.f32 %v2387_v35, %v2270_v63  ;;  %v1181_v25 = vmul.f32 %v2278_v7, %v2421_v11  ;;  %v1182_v15 = vmul.f32 %v2278_v7, %v2444_v0  ;;  %532 = vst.msk [vmem:[#allocation2 + $0x139] sm:$0xff] %vm387_vm2, %v499_v23 }
 0x19b   : > { %v2461_v18 = vpack.c.bf16 %v1483_v2, %v1482_v22  ;;  %v1013_v1 = vadd.f32 %v981_v47, %v913_v16  ;;  %v1112_v46 = vadd.f32 %v1080_v51, %v1012_v37  ;;  %v1330_v43 = vadd.f32 %v1298_v55, %v1230_v39 }
 0x19c   : > { %v1429_v52 = vadd.f32 %v1397_v60, %v1329_v38  ;;  %v1281_v54 = vmul.f32 %v2280_v8, %v2448_v44  ;;  %v1282_v24 = vmul.f32 %v2280_v8, %v2450_v5  ;;  %v1381_v22 = vmul.f32 %v2332_v56, %v2456_v58  ;;  %v468_v51 = vpop.trf.xlu1 }
 0x19d   : > { %3232 = vst [vmem:[#allocation13_spill] sm:$0xff] %v2461_v18  ;;  %v1113_v57 = vadd.f32 %v1081_v31, %v1013_v1  ;;  %v1213_v9 = vadd.f32 %v1181_v25, %v1112_v46  ;;  %v1382_v47 = vmul.f32 %v2332_v56, %v2458_v40  ;;  %v1430_v2 = vadd.f32 %v1398_v21, %v1330_v43  ;;  %v500_v31 = vpop.trf.xlu0 }
 0x19e   : > { %v1468_v16 = vadd.f32 %v2385_v34, %v1429_v52  ;;  %v598_v38 = vmul.f32 %v2319_v48, %v2249_v27  ;;  %v599_v55 = vmul.f32 %v2355_v17, %v2249_v27  ;;  %517 = vst.msk [vmem:[#allocation2 + $0x81] sm:$0xff] %vm387_vm2, %v468_v51  ;;  %v698_v37 = vmul.f32 %v2321_v50, %v2251_v28 }
 0x19f   : > { %v1214_v25 = vadd.f32 %v1182_v15, %v1113_v57  ;;  %v1313_v60 = vadd.f32 %v1281_v54, %v1213_v9  ;;  %v699_v39 = vmul.f32 %v2357_v19, %v2251_v28  ;;  %533 = vst.msk [vmem:[#allocation2 + $0x141] sm:$0xff] %vm387_vm2, %v500_v31  ;;  %v1469_v21 = vadd.f32 %v2385_v34, %v1430_v2  ;;  %v2496_v9 = vld [vmem:[#allocation2 + $0x120] sm:$0xff]  ;;  %v2500_v2 = vld [vmem:[#allocation2 + $0x128] sm:$0xff] }
 0x1a0   : > { %v1500_v23 = vmax.f32 %v1468_v16, 0.0  ;;  %v798_v48 = vmul.f32 %v2359_v20, %v2253_v32  ;;  %v799_v17 = vmul.f32 %v2376_v26, %v2253_v32  ;;  %v730_v46 = vadd.f32 %v698_v37, %v598_v38  ;;  %v469_v43 = vpop.trf.xlu1  ;;  %v2502_v16 = vld [vmem:[#allocation2 + $0x121] sm:$0xff]  ;;  %v2504_v38 = vld [vmem:[#allocation2 + $0x129] sm:$0xff] }
 0x1a1   : > { %v1314_v1 = vadd.f32 %v1282_v24, %v1214_v25  ;;  %v1413_v57 = vadd.f32 %v1381_v22, %v1313_v60  ;;  %v731_v15 = vadd.f32 %v699_v39, %v599_v55  ;;  %v1501_v50 = vmax.f32 %v1469_v21, 0.0  ;;  %518 = vst.msk [vmem:[#allocation2 + $0x91] sm:$0xff] %vm387_vm2, %v469_v43  ;;  %v501_v20 = vpop.trf.xlu0  ;;  %v2515_v60 = vld [vmem:[#allocation2 + $0x122] sm:$0xff] }
 0x1a2   : > { %v898_v19 = vmul.f32 %v2405_v61, %v2263_v49  ;;  %v899_v52 = vmul.f32 %v2425_v10, %v2263_v49  ;;  %v998_v54 = vmul.f32 %v2407_v62, %v2267_v53  ;;  %v830_v22 = vadd.f32 %v798_v48, %v730_v46  ;;  %534 = vst.msk [vmem:[#allocation2 + $0x151] sm:$0xff] %vm387_vm2, %v501_v20 }
 0x1a3   : > { %v1414_v24 = vadd.f32 %v1382_v47, %v1314_v1  ;;  %v1452_v26 = vadd.f32 %v2385_v34, %v1413_v57  ;;  %v831_v51 = vadd.f32 %v799_v17, %v731_v15  ;;  %v2507_v55 = vpack.c.bf16 %v1501_v50, %v1500_v23  ;;  %v2518_v17 = vld [vmem:[#allocation2 + $0x12a] sm:$0xff] }
 0x1a4   : > { %v999_v31 = vmul.f32 %v2427_v14, %v2267_v53  ;;  %v1098_v47 = vmul.f32 %v2429_v45, %v2270_v63  ;;  %v1099_v25 = vmul.f32 %v2440_v59, %v2270_v63  ;;  %v930_v21 = vadd.f32 %v898_v19, %v830_v22  ;;  %v470_v23 = vpop.trf.xlu1 }
 0x1a5   : > { %3233 = vst [vmem:[#allocation14_spill] sm:$0xff] %v2507_v55  ;;  %v1453_v37 = vadd.f32 %v2385_v34, %v1414_v24  ;;  %v1484_v39 = vmax.f32 %v1452_v26, 0.0  ;;  %v931_v48 = vadd.f32 %v899_v52, %v831_v51  ;;  %v1199_v1 = vmul.f32 %v2278_v7, %v2496_v9  ;;  %519 = vst.msk [vmem:[#allocation2 + $0x99] sm:$0xff] %vm387_vm2, %v470_v23  ;;  %v502_v43 = vpop.trf.xlu0 }
 0x1a6   : > { %v1200_v57 = vmul.f32 %v2278_v7, %v2500_v2  ;;  %v1299_v46 = vmul.f32 %v2280_v8, %v2502_v16  ;;  %v1300_v15 = vmul.f32 %v2280_v8, %v2504_v38  ;;  %v1030_v19 = vadd.f32 %v998_v54, %v930_v21  ;;  %535 = vst.msk [vmem:[#allocation2 + $0x159] sm:$0xff] %vm387_vm2, %v502_v43 }
 0x1a7   : > { %v1485_v50 = vmax.f32 %v1453_v37, 0.0  ;;  %v1031_v52 = vadd.f32 %v999_v31, %v931_v48  ;;  %v1399_v20 = vmul.f32 %v2332_v56, %v2515_v60  ;;  %v1400_v24 = vmul.f32 %v2332_v56, %v2518_v17  ;;  %v1514_v48 = vld [vmem:[%s3211_s5] sm:$0xf] }
 0x1a8   : > { %v582_v26 = vmul.f32 %v2310_v41, %v2249_v27  ;;  %v583_v22 = vmul.f32 %v2346_v3, %v2249_v27  ;;  %v682_v51 = vmul.f32 %v2312_v42, %v2251_v28  ;;  %v1130_v54 = vadd.f32 %v1098_v47, %v1030_v19  ;;  %v471_v23 = vpop.trf.xlu1  ;;  %1858 = vmatprep.mubr.msk.f32.mxu1 %vm387_vm2, %v1514_v48  ;;  %v2557_v19 = vld [vmem:[#allocation2 + $0x60] sm:$0xff] }
 0x1a9   : > { %v2540_v37 = vpack.c.bf16 %v1485_v50, %v1484_v39  ;;  %v1131_v31 = vadd.f32 %v1099_v25, %v1031_v52  ;;  %v683_v21 = vmul.f32 %v2348_v4, %v2251_v28  ;;  %v782_v41 = vmul.f32 %v2350_v6, %v2253_v32  ;;  %520 = vst.msk [vmem:[#allocation2 + $0xa9] sm:$0xff] %vm387_vm2, %v471_v23  ;;  %v503_v4 = vpop.trf.xlu0  ;;  %v2559_v6 = vld [vmem:[#allocation2 + $0x68] sm:$0xff] }
 0x1aa   : > { %v714_v43 = vadd.f32 %v682_v51, %v582_v26  ;;  %v783_v3 = vmul.f32 %v2387_v35, %v2253_v32  ;;  %v882_v42 = vmul.f32 %v2421_v11, %v2263_v49  ;;  %v1231_v47 = vadd.f32 %v1199_v1, %v1130_v54  ;;  %v2561_v52 = vld [vmem:[#allocation2 + $0x61] sm:$0xff]  ;;  %536 = vst.msk [vmem:[#allocation2 + $0x169] sm:$0xff] %vm387_vm2, %v503_v4  ;;  %v2576_v23 = vld [vmem:[#allocation2 + $0x6a] sm:$0xff] }
 0x1ab   : > { %3234 = vst [vmem:[#allocation15_spill] sm:$0xff] %v2540_v37  ;;  %v1232_v25 = vadd.f32 %v1200_v57, %v1131_v31  ;;  %v715_v39 = vadd.f32 %v683_v21, %v583_v22  ;;  %v883_v50 = vmul.f32 %v2444_v0, %v2263_v49  ;;  %v982_v26 = vmul.f32 %v2448_v44, %v2267_v53  ;;  %v2570_v22 = vld [vmem:[#allocation2 + $0x69] sm:$0xff] }
 0x1ac   : > { %v814_v35 = vadd.f32 %v782_v41, %v714_v43  ;;  %v983_v1 = vmul.f32 %v2450_v5, %v2267_v53  ;;  %v1082_v57 = vmul.f32 %v2456_v58, %v2270_v63  ;;  %v1331_v51 = vadd.f32 %v1299_v46, %v1231_v47  ;;  %v2574_v48 = vld [vmem:[#allocation2 + $0x62] sm:$0xff]  ;;  %v472_v43 = vpop.trf.xlu1 }
 0x1ad   : > { %v1332_v54 = vadd.f32 %v1300_v15, %v1232_v25  ;;  %v815_v31 = vadd.f32 %v783_v3, %v715_v39  ;;  %v1083_v21 = vmul.f32 %v2458_v40, %v2270_v63  ;;  %v1183_v4 = vmul.f32 %v2278_v7, %v2557_v19  ;;  %521 = vst.msk [vmem:[#allocation2 + $0xb1] sm:$0xff] %vm387_vm2, %v472_v43  ;;  %v504_v15 = vpop.trf.xlu0 }
 0x1ae   : > { %v914_v41 = vadd.f32 %v882_v42, %v814_v35  ;;  %v1184_v37 = vmul.f32 %v2278_v7, %v2559_v6  ;;  %v1283_v46 = vmul.f32 %v2280_v8, %v2561_v52  ;;  %v1431_v3 = vadd.f32 %v1399_v20, %v1331_v51  ;;  %537 = vst.msk [vmem:[#allocation2 + $0x171] sm:$0xff] %vm387_vm2, %v504_v15  ;;  %v1515_v20 = vld [vmem:[%s3212_s6] sm:$0xf] }
 0x1af   : > { %v1432_v47 = vadd.f32 %v1400_v24, %v1332_v54  ;;  %v915_v25 = vadd.f32 %v883_v50, %v815_v31  ;;  %v1284_v39 = vmul.f32 %v2280_v8, %v2570_v22  ;;  %v1383_v35 = vmul.f32 %v2332_v56, %v2574_v48  ;;  %1518 = vperm.xlu1 %1950, %v1515_v20  }
 0x1b0   : > { %v1014_v42 = vadd.f32 %v982_v26, %v914_v41  ;;  %v1384_v55 = vmul.f32 %v2332_v56, %v2576_v23  ;;  %v600_v18 = vmul.f32 %v2405_v61, %v2249_v27  ;;  %v1470_v24 = vadd.f32 %v2385_v34, %v1431_v3  ;;  %v473_v54 = vpop.trf.xlu1 }
 0x1b1   : > { %v1471_v50 = vadd.f32 %v2385_v34, %v1432_v47  ;;  %v1015_v51 = vadd.f32 %v983_v1, %v915_v25  ;;  %v601_v26 = vmul.f32 %v2425_v10, %v2249_v27  ;;  %v700_v43 = vmul.f32 %v2407_v62, %v2251_v28  ;;  %522 = vst.msk [vmem:[#allocation2 + $0xc1] sm:$0xff] %vm387_vm2, %v473_v54  ;;  %v505_v15 = vpop.trf.xlu0  ;;  %v2625_v54 = vld [vmem:[#allocation2 + $0x139] sm:$0xff] }
 0x1b2   : > { %v1114_v31 = vadd.f32 %v1082_v57, %v1014_v42  ;;  %v701_v61 = vmul.f32 %v2427_v14, %v2251_v28  ;;  %v800_v41 = vmul.f32 %v2429_v45, %v2253_v32  ;;  %v1502_v3 = vmax.f32 %v1470_v24, 0.0  ;;  %538 = vst.msk [vmem:[#allocation2 + $0x181] sm:$0xff] %vm387_vm2, %v505_v15  ;;  %v2613_v42 = vld [vmem:[#allocation2 + $0x138] sm:$0xff]  ;;  %3236 = vst [vmem:[#allocation17_spill] sm:$0xff] %v2625_v54 }
 0x1b3   : > { %v1503_v1 = vmax.f32 %v1471_v50, 0.0  ;;  %v1115_v47 = vadd.f32 %v1083_v21, %v1015_v51  ;;  %v801_v10 = vmul.f32 %v2440_v59, %v2253_v32  ;;  %v732_v25 = vadd.f32 %v700_v43, %v600_v18  ;;  %v2621_v59 = vld [vmem:[#allocation2 + $0x140] sm:$0xff] }
 0x1b4   : > { %v1215_v57 = vadd.f32 %v1183_v4, %v1114_v31  ;;  %v733_v62 = vadd.f32 %v701_v61, %v601_v26  ;;  %v900_v14 = vmul.f32 %v2496_v9, %v2263_v49  ;;  %v901_v24 = vmul.f32 %v2500_v2, %v2263_v49  ;;  %v474_v50 = vpop.trf.xlu1  ;;  %v2627_v31 = vld [vmem:[#allocation2 + $0x141] sm:$0xff] }
 0x1b5   : > { %v2615_v45 = vpack.c.bf16 %v1503_v1, %v1502_v3  ;;  %v1216_v20 = vadd.f32 %v1184_v37, %v1115_v47  ;;  %v1000_v21 = vmul.f32 %v2502_v16, %v2267_v53  ;;  %v832_v18 = vadd.f32 %v800_v41, %v732_v25  ;;  %3237 = vst [vmem:[#allocation18_spill] sm:$0xff] %v2627_v31  ;;  %v2629_v37 = vld [vmem:[#allocation2 + $0x13a] sm:$0xff]  ;;  %v506_v43 = vpop.trf.xlu0  ;;  %v2638_v3 = vld [vmem:[#allocation2 + $0x142] sm:$0xff] }
 0x1b6   : > { %v1315_v4 = vadd.f32 %v1283_v46, %v1215_v57  ;;  %v833_v51 = vadd.f32 %v801_v10, %v733_v62  ;;  %v1001_v26 = vmul.f32 %v2504_v38, %v2267_v53  ;;  %3238 = vst [vmem:[#allocation19_spill] sm:$0xff] %v2629_v37  ;;  %523 = vst.msk [vmem:[#allocation2 + $0xc9] sm:$0xff] %vm387_vm2, %v474_v50 }
 0x1b7   : > { %3235 = vst [vmem:[#allocation16_spill] sm:$0xff] %v2615_v45  ;;  %v1316_v61 = vadd.f32 %v1284_v39, %v1216_v20  ;;  %v1100_v15 = vmul.f32 %v2515_v60, %v2270_v63  ;;  %v1101_v46 = vmul.f32 %v2518_v17, %v2270_v63  ;;  %v1201_v41 = vmul.f32 %v2278_v7, %v2613_v42 }
 0x1b8   : > { %3239 = vst [vmem:[#allocation20_spill] sm:$0xff] %v2638_v3  ;;  %539 = vst.msk [vmem:[#allocation2 + $0x189] sm:$0xff] %vm387_vm2, %v506_v43  ;;  %v1415_v1 = vadd.f32 %v1383_v35, %v1315_v4  ;;  %v932_v47 = vadd.f32 %v900_v14, %v832_v18  ;;  %v933_v10 = vadd.f32 %v901_v24, %v833_v51  ;;  %v558_v50 = vld [vmem:[#allocation2 + $0xc0] sm:$0xff] }
 0x1b9   : > { %v1202_v57 = vmul.f32 %v2278_v7, %v2621_v59  ;;  %v1416_v39 = vadd.f32 %v1384_v55, %v1316_v61  ;;  %v1301_v25 = vmul.f32 %v2280_v8, %v2625_v54  ;;  %v1302_v62 = vmul.f32 %v2280_v8, %v2627_v31  ;;  %v658_v45 = vld [vmem:[#allocation2 + $0xc1] sm:$0xff] }
 0x1ba   : > { %v1401_v20 = vmul.f32 %v2332_v56, %v2629_v37  ;;  %v1454_v43 = vadd.f32 %v2385_v34, %v1415_v1  ;;  %v1032_v35 = vadd.f32 %v1000_v21, %v932_v47  ;;  %v1033_v14 = vadd.f32 %v1001_v26, %v933_v10 }
 0x1bb   : > { %v1402_v24 = vmul.f32 %v2332_v56, %v2638_v3  ;;  %v594_v55 = vmul.f32 %v2249_v27, %v558_v50  ;;  %v694_v4 = vmul.f32 %v2251_v28, %v658_v45  ;;  %v1455_v18 = vadd.f32 %v2385_v34, %v1416_v39 }
 0x1bc   : > { %v584_v51 = vmul.f32 %v2421_v11, %v2249_v27  ;;  %v1486_v61 = vmax.f32 %v1454_v43, 0.0  ;;  %v1132_v37 = vadd.f32 %v1100_v15, %v1032_v35  ;;  %v1133_v31 = vadd.f32 %v1101_v46, %v1033_v14 }
 0x1bd   : > { %v585_v1 = vmul.f32 %v2444_v0, %v2249_v27  ;;  %v726_v21 = vadd.f32 %v694_v4, %v594_v55  ;;  %v1487_v26 = vmax.f32 %v1455_v18, 0.0  ;;  %v684_v47 = vmul.f32 %v2448_v44, %v2251_v28  ;;  %v559_v45 = vld [vmem:[#allocation2 + $0xc8] sm:$0xff] }
 0x1be   : > { %v685_v10 = vmul.f32 %v2450_v5, %v2251_v28  ;;  %v659_v50 = vld [vmem:[#allocation2 + $0xc9] sm:$0xff]  ;;  %v1233_v3 = vadd.f32 %v1201_v41, %v1132_v37  ;;  %v1234_v54 = vadd.f32 %v1202_v57, %v1133_v31  ;;  %v784_v11 = vmul.f32 %v2456_v58, %v2253_v32 }
 0x1bf   : > { %v758_v39 = vld [vmem:[#allocation2 + $0xc2] sm:$0xff]  ;;  %v785_v15 = vmul.f32 %v2458_v40, %v2253_v32  ;;  %v595_v0 = vmul.f32 %v2249_v27, %v559_v45  ;;  %v695_v46 = vmul.f32 %v2251_v28, %v659_v50  ;;  %v759_v43 = vld [vmem:[#allocation2 + $0xca] sm:$0xff]  ;;  %v2670_v35 = vpack.c.bf16 %v1487_v26, %v1486_v61 }
 0x1c0   : > { %v794_v44 = vmul.f32 %v2253_v32, %v758_v39  ;;  %v795_v5 = vmul.f32 %v2253_v32, %v759_v43  ;;  %v1333_v14 = vadd.f32 %v1301_v25, %v1233_v3  ;;  %v1334_v37 = vadd.f32 %v1302_v62, %v1234_v54 }
 0x1c1   : > { %v716_v31 = vadd.f32 %v684_v47, %v584_v51  ;;  %v727_v41 = vadd.f32 %v695_v46, %v595_v0  ;;  %v717_v58 = vadd.f32 %v685_v10, %v585_v1  ;;  %v884_v40 = vmul.f32 %v2557_v19, %v2263_v49  ;;  %v2690_v47 = vld [vmem:[#allocation2 + $0x80] sm:$0xff] }
 0x1c2   : > { %v826_v57 = vadd.f32 %v794_v44, %v726_v21  ;;  %v1433_v55 = vadd.f32 %v1401_v20, %v1333_v14  ;;  %v1434_v4 = vadd.f32 %v1402_v24, %v1334_v37  ;;  %v885_v45 = vmul.f32 %v2559_v6, %v2263_v49  ;;  %v2684_v24 = vld [vmem:[#allocation2 + $0x78] sm:$0xff]  ;;  %v2696_v46 = vld [vmem:[#allocation2 + $0x81] sm:$0xff] }
 0x1c3   : > { %v816_v18 = vadd.f32 %v784_v11, %v716_v31  ;;  %v827_v50 = vadd.f32 %v795_v5, %v727_v41  ;;  %v817_v26 = vadd.f32 %v785_v15, %v717_v58  ;;  %v984_v54 = vmul.f32 %v2561_v52, %v2267_v53  ;;  %v2692_v10 = vld [vmem:[#allocation2 + $0x79] sm:$0xff]  ;;  %v2704_v14 = vld [vmem:[#allocation2 + $0x82] sm:$0xff] }
 0x1c4   : > { %v926_v61 = vadd.f32 %v2284_v12, %v826_v57  ;;  %v1472_v3 = vadd.f32 %v2385_v34, %v1433_v55  ;;  %v1473_v25 = vadd.f32 %v2385_v34, %v1434_v4  ;;  %v985_v20 = vmul.f32 %v2570_v22, %v2267_v53  ;;  %v2702_v5 = vld [vmem:[#allocation2 + $0x7a] sm:$0xff] }
 0x1c5   : > { %v916_v62 = vadd.f32 %v884_v40, %v816_v18  ;;  %v927_v51 = vadd.f32 %v2297_v29, %v827_v50  ;;  %v917_v21 = vadd.f32 %v885_v45, %v817_v26  ;;  %v1084_v12 = vmul.f32 %v2574_v48, %v2270_v63 }
 0x1c6   : > { %v1026_v1 = vadd.f32 %v2287_v13, %v926_v61  ;;  %v1504_v39 = vmax.f32 %v1472_v3, 0.0  ;;  %v1505_v11 = vmax.f32 %v1473_v25, 0.0  ;;  %v1085_v0 = vmul.f32 %v2576_v23, %v2270_v63  ;;  %v3241_v61 = vld [vmem:[#allocation9_spill] sm:$0xff] }
 0x1c7   : > { %v1016_v15 = vadd.f32 %v984_v54, %v916_v62  ;;  %v1027_v29 = vadd.f32 %v2300_v30, %v927_v51  ;;  %v1017_v43 = vadd.f32 %v985_v20, %v917_v21  ;;  %v1185_v44 = vmul.f32 %v2278_v7, %v2684_v24  ;;  %v3242_v54 = vld [vmem:[#allocation8_spill] sm:$0xff]  ;;  %v3243_v21 = vld [vmem:[#allocation10_spill] sm:$0xff] }
 0x1c8   : > { %v1126_v13 = vadd.f32 %v2303_v33, %v1026_v1  ;;  %v2706_v37 = vpack.c.bf16 %v1505_v11, %v1504_v39  ;;  %v1186_v41 = vmul.f32 %v2278_v7, %v2690_v47  ;;  %v1285_v57 = vmul.f32 %v2280_v8, %v2692_v10  ;;  %v3240_v33 = vld [vmem:[#allocation7_spill] sm:$0xff] }
 0x1c9   : > { %v1116_v31 = vadd.f32 %v1084_v12, %v1016_v15  ;;  %v1127_v30 = vadd.f32 %v2307_v36, %v1027_v29  ;;  %v1117_v40 = vadd.f32 %v1085_v0, %v1017_v43  ;;  %v1286_v55 = vmul.f32 %v2280_v8, %v2696_v46  ;;  %v3244_v12 = vld [vmem:[#allocation11_spill] sm:$0xff] }
 0x1ca   : > { %v1227_v58 = vadd.f32 %v3240_v33, %v1126_v13  ;;  %v1385_v18 = vmul.f32 %v2332_v56, %v2702_v5  ;;  %v1386_v45 = vmul.f32 %v2332_v56, %v2704_v14  ;;  %v602_v50 = vmul.f32 %v2496_v9, %v2249_v27  ;;  %v3245_v13 = vld [vmem:[#allocation12_spill] sm:$0xff] }
 0x1cb   : > { %v1217_v4 = vadd.f32 %v1185_v44, %v1116_v31  ;;  %v1228_v26 = vadd.f32 %v3241_v61, %v1127_v30  ;;  %v1218_v3 = vadd.f32 %v1186_v41, %v1117_v40  ;;  %v603_v25 = vmul.f32 %v2500_v2, %v2249_v27  ;;  %v2745_v33 = vld [vmem:[#allocation2 + $0x150] sm:$0xff] }
 0x1cc   : > { %v1327_v36 = vadd.f32 %v3242_v54, %v1227_v58  ;;  %v702_v20 = vmul.f32 %v2502_v16, %v2251_v28  ;;  %v703_v51 = vmul.f32 %v2504_v38, %v2251_v28  ;;  %v802_v1 = vmul.f32 %v2515_v60, %v2253_v32 }
 0x1cd   : > { %v1317_v62 = vadd.f32 %v1285_v57, %v1217_v4  ;;  %v1328_v9 = vadd.f32 %v3243_v21, %v1228_v26  ;;  %v1318_v11 = vadd.f32 %v1286_v55, %v1218_v3  ;;  %v803_v15 = vmul.f32 %v2518_v17, %v2253_v32  ;;  %v3246_v17 = vld [vmem:[#allocation17_spill] sm:$0xff]  ;;  %v3247_v4 = vld [vmem:[#allocation18_spill] sm:$0xff] }
 0x1ce   : > { %v1427_v39 = vadd.f32 %v3244_v12, %v1327_v36  ;;  %v734_v2 = vadd.f32 %v702_v20, %v602_v50  ;;  %v735_v29 = vadd.f32 %v703_v51, %v603_v25  ;;  %v902_v16 = vmul.f32 %v2613_v42, %v2263_v49  ;;  %v2753_v50 = vld [vmem:[#allocation2 + $0x151] sm:$0xff]  ;;  %v3248_v36 = vld [vmem:[#allocation19_spill] sm:$0xff]  ;;  %v2757_v25 = vld [vmem:[#allocation2 + $0x159] sm:$0xff] }
 0x1cf   : > { %v1417_v0 = vadd.f32 %v1385_v18, %v1317_v62  ;;  %v1428_v43 = vadd.f32 %v3245_v13, %v1328_v9  ;;  %v1418_v44 = vadd.f32 %v1386_v45, %v1318_v11  ;;  %v903_v60 = vmul.f32 %v2621_v59, %v2263_v49  ;;  %v2751_v45 = vld [vmem:[#allocation2 + $0x158] sm:$0xff] }
 0x1d0   : > { %v1466_v38 = vadd.f32 %v2385_v34, %v1427_v39  ;;  %v834_v41 = vadd.f32 %v802_v1, %v734_v2  ;;  %v835_v57 = vadd.f32 %v803_v15, %v735_v29  ;;  %v1002_v30 = vmul.f32 %v3246_v17, %v2267_v53  ;;  %v2759_v62 = vld [vmem:[#allocation2 + $0x152] sm:$0xff]  ;;  %v2765_v12 = vld [vmem:[#allocation2 + $0x15a] sm:$0xff] }
 0x1d1   : > { %v1456_v31 = vadd.f32 %v2385_v34, %v1417_v0  ;;  %v1467_v58 = vadd.f32 %v2385_v34, %v1428_v43  ;;  %v1457_v55 = vadd.f32 %v2385_v34, %v1418_v44  ;;  %v1003_v18 = vmul.f32 %v3247_v4, %v2267_v53  ;;  %v3249_v1 = vld [vmem:[#allocation20_spill] sm:$0xff]  ;;  %v3256_v39 = vld [vmem:[#allocation6_spill] sm:$0xff] }
 0x1d2   : > { %v1498_v40 = vmax.f32 %v1466_v38, 0.0  ;;  %v934_v26 = vadd.f32 %v902_v16, %v834_v41  ;;  %v935_v54 = vadd.f32 %v903_v60, %v835_v57  ;;  %v1102_v3 = vmul.f32 %v3248_v36, %v2270_v63 }
 0x1d3   : > { %v1488_v61 = vmax.f32 %v1456_v31, 0.0  ;;  %v1499_v20 = vmax.f32 %v1467_v58, 0.0  ;;  %v1489_v51 = vmax.f32 %v1457_v55, 0.0  ;;  %v1103_v21 = vmul.f32 %v3249_v1, %v2270_v63 }
 0x1d4   : > { %v1203_v9 = vmul.f32 %v2278_v7, %v2745_v33  ;;  %v1034_v11 = vadd.f32 %v1002_v30, %v934_v26  ;;  %v1035_v15 = vadd.f32 %v1003_v18, %v935_v54  ;;  %v1204_v0 = vmul.f32 %v2278_v7, %v2751_v45 }
 0x1d5   : > { %v1303_v2 = vmul.f32 %v2280_v8, %v2753_v50  ;;  %v1860_v29 = vpack.c.bf16 %v1499_v20, %v1498_v40  ;;  %v2777_v16 = vpack.c.bf16 %v1489_v51, %v1488_v61  ;;  %v1304_v13 = vmul.f32 %v2280_v8, %v2757_v25  ;;  %v3252_v40 = vld [vmem:[#allocation13_spill] sm:$0xff]  ;;  %v2804_v61 = vld [vmem:[#allocation2 + $0x90] sm:$0xff] }
 0x1d6   : > { %v1403_v43 = vmul.f32 %v2332_v56, %v2759_v62  ;;  %v1134_v38 = vadd.f32 %v1102_v3, %v1034_v11  ;;  %v1135_v44 = vadd.f32 %v1103_v21, %v1035_v15  ;;  %v1404_v60 = vmul.f32 %v2332_v56, %v2765_v12  ;;  %v2813_v3 = vld [vmem:[#allocation2 + $0x98] sm:$0xff] }
 0x1d7   : > { %v586_v31 = vmul.f32 %v2557_v19, %v2249_v27  ;;  %1862 = vmatprep.subr.msk.bf16.mxu1 %vm2769_vm4, %v1860_v29  ;;  %v587_v41 = vmul.f32 %v2559_v6, %v2249_v27  ;;  %v686_v57 = vmul.f32 %v2561_v52, %v2251_v28  ;;  %v687_v30 = vmul.f32 %v2570_v22, %v2251_v28  ;;  %v3253_v52 = vld [vmem:[#allocation14_spill] sm:$0xff]  ;;  %v2823_v15 = vld [vmem:[#allocation2 + $0x92] sm:$0xff] }
 0x1d8   : > { %v786_v58 = vmul.f32 %v2574_v48, %v2253_v32  ;;  %1865 = vmatpush3.bf16.xpose.msk.msra.mxu1 %vm2769_vm4, %v3252_v40  ;;  %v1235_v19 = vadd.f32 %v1203_v9, %v1134_v38  ;;  %v1236_v55 = vadd.f32 %v1204_v0, %v1135_v44  ;;  %v787_v18 = vmul.f32 %v2576_v23, %v2253_v32  ;;  %v2815_v23 = vld [vmem:[#allocation2 + $0x91] sm:$0xff]  ;;  %v2821_v11 = vld [vmem:[#allocation2 + $0x99] sm:$0xff] }
 0x1d9   : > { %v886_v6 = vmul.f32 %v2684_v24, %v2263_v49  ;;  %1868 = vmatprep.subr.msk.bf16.mxu1 %vm2769_vm4, %v3253_v52  ;;  %v718_v22 = vadd.f32 %v686_v57, %v586_v31  ;;  %v719_v48 = vadd.f32 %v687_v30, %v587_v41  ;;  %v887_v26 = vmul.f32 %v2690_v47, %v2263_v49 }
 0x1da   : > { %v986_v54 = vmul.f32 %v2692_v10, %v2267_v53  ;;  %v1335_v20 = vadd.f32 %v1303_v2, %v1235_v19  ;;  %v1336_v51 = vadd.f32 %v1304_v13, %v1236_v55  ;;  %v987_v21 = vmul.f32 %v2696_v46, %v2267_v53  ;;  %v2829_v2 = vld [vmem:[#allocation2 + $0x9a] sm:$0xff] }
 0x1db   : > { %v1086_v9 = vmul.f32 %v2702_v5, %v2270_v63  ;;  %v818_v0 = vadd.f32 %v786_v58, %v718_v22  ;;  %v819_v29 = vadd.f32 %v787_v18, %v719_v48  ;;  %v1087_v38 = vmul.f32 %v2704_v14, %v2270_v63 }
 0x1dc   : > { %v1187_v44 = vmul.f32 %v2278_v7, %v2804_v61  ;;  %v1435_v13 = vadd.f32 %v1403_v43, %v1335_v20  ;;  %v1436_v31 = vadd.f32 %v1404_v60, %v1336_v51  ;;  %v1188_v41 = vmul.f32 %v2278_v7, %v2813_v3 }
 0x1dd   : > { %v1287_v57 = vmul.f32 %v2280_v8, %v2815_v23  ;;  %v918_v30 = vadd.f32 %v886_v6, %v818_v0  ;;  %v919_v40 = vadd.f32 %v887_v26, %v819_v29  ;;  %v1288_v58 = vmul.f32 %v2280_v8, %v2821_v11  ;;  %v3254_v26 = vld [vmem:[#allocation15_spill] sm:$0xff] }
 0x1de   : > { %v1387_v19 = vmul.f32 %v2332_v56, %v2823_v15  ;;  %v1474_v55 = vadd.f32 %v2385_v34, %v1435_v13  ;;  %v1475_v18 = vadd.f32 %v2385_v34, %v1436_v31  ;;  %v1388_v43 = vmul.f32 %v2332_v56, %v2829_v2 }
 0x1df   : > { %v604_v60 = vmul.f32 %v2613_v42, %v2249_v27  ;;  %v1018_v52 = vadd.f32 %v986_v54, %v918_v30  ;;  %v1019_v22 = vadd.f32 %v987_v21, %v919_v40  ;;  %v605_v6 = vmul.f32 %v2621_v59, %v2249_v27  ;;  %v3255_v54 = vld [vmem:[#allocation16_spill] sm:$0xff] }
 0x1e0   : > { %v704_v48 = vmul.f32 %v3246_v17, %v2251_v28  ;;  %1871 = vmatpush3.bf16.xpose.msk.msra.mxu1 %vm2769_vm4, %v3254_v26  ;;  %v1506_v20 = vmax.f32 %v1474_v55, 0.0  ;;  %v1507_v51 = vmax.f32 %v1475_v18, 0.0  ;;  %v705_v0 = vmul.f32 %v3247_v4, %v2251_v28 }
 0x1e1   : > { %v804_v42 = vmul.f32 %v3248_v36, %v2253_v32  ;;  %1874 = vmatprep.subr.msk.bf16.mxu1 %vm2769_vm4, %v3255_v54  ;;  %v1118_v59 = vadd.f32 %v1086_v9, %v1018_v52  ;;  %v1119_v21 = vadd.f32 %v1087_v38, %v1019_v22  ;;  %v805_v17 = vmul.f32 %v3249_v1, %v2253_v32  ;;  %v2867_v36 = vld [vmem:[#allocation2 + $0x168] sm:$0xff]  ;;  %v2871_v38 = vld [vmem:[#allocation2 + $0x170] sm:$0xff] }
 0x1e2   : > { %v736_v29 = vadd.f32 %v704_v48, %v604_v60  ;;  %v2861_v13 = vpack.c.bf16 %v1507_v51, %v1506_v20  ;;  %v737_v31 = vadd.f32 %v705_v0, %v605_v6  ;;  %v904_v30 = vmul.f32 %v2745_v33, %v2263_v49  ;;  %v2873_v1 = vld [vmem:[#allocation2 + $0x169] sm:$0xff]  ;;  %v2875_v60 = vld [vmem:[#allocation2 + $0x171] sm:$0xff] }
 0x1e3   : > { %v905_v4 = vmul.f32 %v2751_v45, %v2263_v49  ;;  %v1219_v40 = vadd.f32 %v1187_v44, %v1118_v59  ;;  %v1220_v55 = vadd.f32 %v1188_v41, %v1119_v21  ;;  %v1004_v9 = vmul.f32 %v2753_v50, %v2267_v53  ;;  %v2883_v41 = vld [vmem:[#allocation2 + $0x16a] sm:$0xff]  ;;  %v2887_v0 = vld [vmem:[#allocation2 + $0x172] sm:$0xff] }
 0x1e4   : > { %v836_v18 = vadd.f32 %v804_v42, %v736_v29  ;;  %v837_v52 = vadd.f32 %v805_v17, %v737_v31  ;;  %v1005_v22 = vmul.f32 %v2757_v25, %v2267_v53  ;;  %v1104_v6 = vmul.f32 %v2759_v62, %v2270_v63 }
 0x1e5   : > { %v1105_v44 = vmul.f32 %v2765_v12, %v2270_v63  ;;  %v1319_v48 = vadd.f32 %v1287_v57, %v1219_v40  ;;  %v1320_v26 = vadd.f32 %v1288_v58, %v1220_v55  ;;  %v1205_v51 = vmul.f32 %v2278_v7, %v2867_v36 }
 0x1e6   : > { %v936_v20 = vadd.f32 %v904_v30, %v836_v18  ;;  %v937_v42 = vadd.f32 %v905_v4, %v837_v52  ;;  %v1206_v54 = vmul.f32 %v2278_v7, %v2871_v38  ;;  %v1305_v59 = vmul.f32 %v2280_v8, %v2873_v1 }
 0x1e7   : > { %v1306_v21 = vmul.f32 %v2280_v8, %v2875_v60  ;;  %v1419_v29 = vadd.f32 %v1387_v19, %v1319_v48  ;;  %v1420_v17 = vadd.f32 %v1388_v43, %v1320_v26  ;;  %v1405_v58 = vmul.f32 %v2332_v56, %v2883_v41 }
 0x1e8   : > { %v1036_v57 = vadd.f32 %v1004_v9, %v936_v20  ;;  %1877 = vmatpush3.bf16.xpose.msk.msra.mxu1 %vm2769_vm4, %v2670_v35  ;;  %v1037_v31 = vadd.f32 %v1005_v22, %v937_v42  ;;  %v1406_v30 = vmul.f32 %v2332_v56, %v2887_v0  ;;  %v588_v4 = vmul.f32 %v2684_v24, %v2249_v27  ;;  %v2927_v42 = vld [vmem:[#allocation2 + $0xb0] sm:$0xff] }
 0x1e9   : > { %v589_v40 = vmul.f32 %v2690_v47, %v2249_v27  ;;  %1880 = vmatprep.subr.msk.bf16.mxu1 %vm2769_vm4, %v2706_v37  ;;  %v1458_v19 = vadd.f32 %v2385_v34, %v1419_v29  ;;  %v1459_v43 = vadd.f32 %v2385_v34, %v1420_v17  ;;  %v688_v35 = vmul.f32 %v2692_v10, %v2251_v28 }
 0x1ea   : > { %v1136_v55 = vadd.f32 %v1104_v6, %v1036_v57  ;;  %v1137_v18 = vadd.f32 %v1105_v44, %v1037_v31  ;;  %v689_v56 = vmul.f32 %v2696_v46, %v2251_v28  ;;  %v788_v24 = vmul.f32 %v2702_v5, %v2253_v32  ;;  %v2923_v44 = vld [vmem:[#allocation2 + $0xa8] sm:$0xff]  ;;  %v2935_v31 = vld [vmem:[#allocation2 + $0xb1] sm:$0xff] }
 0x1eb   : > { %v789_v47 = vmul.f32 %v2704_v14, %v2253_v32  ;;  %v1490_v9 = vmax.f32 %v1458_v19, 0.0  ;;  %v1491_v37 = vmax.f32 %v1459_v43, 0.0  ;;  %v720_v22 = vadd.f32 %v688_v35, %v588_v4  ;;  %v2937_v4 = vld [vmem:[#allocation2 + $0xaa] sm:$0xff] }
 0x1ec   : > { %v1237_v52 = vadd.f32 %v1205_v51, %v1136_v55  ;;  %v1238_v48 = vadd.f32 %v1206_v54, %v1137_v18  ;;  %v721_v26 = vadd.f32 %v689_v56, %v589_v40  ;;  %v888_v6 = vmul.f32 %v2804_v61, %v2263_v49  ;;  %v2929_v51 = vld [vmem:[#allocation2 + $0xa9] sm:$0xff] }
 0x1ed   : > { %v889_v10 = vmul.f32 %v2813_v3, %v2263_v49  ;;  %v1887_v46 = vpack.c.bf16 %v1491_v37, %v1490_v9  ;;  %v820_v5 = vadd.f32 %v788_v24, %v720_v22  ;;  %v988_v14 = vmul.f32 %v2815_v23, %v2267_v53 }
 0x1ee   : > { %v1337_v20 = vadd.f32 %v1305_v59, %v1237_v52  ;;  %v1338_v54 = vadd.f32 %v1306_v21, %v1238_v48  ;;  %v821_v29 = vadd.f32 %v789_v47, %v721_v26  ;;  %v989_v17 = vmul.f32 %v2821_v11, %v2267_v53  ;;  %v2943_v21 = vld [vmem:[#allocation2 + $0xb2] sm:$0xff] }
 0x1ef   : > { %v1088_v57 = vmul.f32 %v2823_v15, %v2270_v63  ;;  %v920_v40 = vadd.f32 %v888_v6, %v820_v5  ;;  %v1089_v19 = vmul.f32 %v2829_v2, %v2270_v63  ;;  %v1189_v43 = vmul.f32 %v2278_v7, %v2923_v44 }
 0x1f0   : > { %v1437_v59 = vadd.f32 %v1405_v58, %v1337_v20  ;;  %1883 = vmatpush3.bf16.xpose.msk.msra.mxu1 %vm2769_vm4, %v2777_v16  ;;  %v1438_v55 = vadd.f32 %v1406_v30, %v1338_v54  ;;  %v921_v35 = vadd.f32 %v889_v10, %v821_v29  ;;  %v1190_v18 = vmul.f32 %v2278_v7, %v2927_v42  ;;  %v2961_v16 = vld [vmem:[%s3209_s3 + $0x8] ss:$0 sm:$0xff] }
 0x1f1   : > { %v1289_v58 = vmul.f32 %v2280_v8, %v2929_v51  ;;  %1886 = vmatprep.subr.msk.bf16.mxu1 %vm2769_vm4, %v2861_v13  ;;  %v1020_v24 = vadd.f32 %v988_v14, %v920_v40  ;;  %v1290_v47 = vmul.f32 %v2280_v8, %v2935_v31  ;;  %v1389_v30 = vmul.f32 %v2961_v16, %v2937_v4 }
 0x1f2   : > { %v1476_v56 = vadd.f32 %v2385_v34, %v1437_v59  ;;  %v1477_v9 = vadd.f32 %v2385_v34, %v1438_v55  ;;  %v1021_v37 = vadd.f32 %v989_v17, %v921_v35  ;;  %v1390_v13 = vmul.f32 %v2961_v16, %v2943_v21  ;;  %v2984_v59 = vld [vmem:[#allocation2 + $0x180] sm:$0xff]  ;;  %v2994_v55 = vld [vmem:[#allocation2 + $0x189] sm:$0xff] }
 0x1f3   : > { %v606_v52 = vmul.f32 %v2745_v33, %v2249_v27  ;;  %v1120_v48 = vadd.f32 %v1088_v57, %v1020_v24  ;;  %v607_v26 = vmul.f32 %v2751_v45, %v2249_v27  ;;  %v706_v6 = vmul.f32 %v2753_v50, %v2251_v28  ;;  %v3002_v24 = vld [vmem:[#allocation2 + $0x182] sm:$0xff] }
 0x1f4   : > { %v1508_v22 = vmax.f32 %v1476_v56, 0.0  ;;  %v1509_v10 = vmax.f32 %v1477_v9, 0.0  ;;  %v1121_v20 = vadd.f32 %v1089_v19, %v1021_v37  ;;  %v707_v34 = vmul.f32 %v2757_v25, %v2251_v28  ;;  %v2986_v25 = vld [vmem:[#allocation2 + $0x188] sm:$0xff] }
 0x1f5   : > { %v806_v5 = vmul.f32 %v2759_v62, %v2253_v32  ;;  %v1221_v14 = vadd.f32 %v1189_v43, %v1120_v48  ;;  %v738_v54 = vadd.f32 %v706_v6, %v606_v52  ;;  %v807_v33 = vmul.f32 %v2765_v12, %v2253_v32  ;;  %v2992_v43 = vld [vmem:[#allocation2 + $0x181] sm:$0xff]  ;;  %v3004_v9 = vld [vmem:[#allocation2 + $0x18a] sm:$0xff] }
 0x1f6   : > { %v906_v29 = vmul.f32 %v2867_v36, %v2263_v49  ;;  %v1890_v45 = vpack.c.bf16 %v1509_v10, %v1508_v22  ;;  %v1222_v17 = vadd.f32 %v1190_v18, %v1121_v20  ;;  %v739_v57 = vadd.f32 %v707_v34, %v607_v26  ;;  %v3019_v10 = vld [vmem:[%s3210_s4] ss:$0 sm:$0xff] }
 0x1f7   : > { %v907_v50 = vmul.f32 %v2871_v38, %v2263_v49  ;;  %v1321_v40 = vadd.f32 %v1289_v58, %v1221_v14  ;;  %v838_v62 = vadd.f32 %v806_v5, %v738_v54  ;;  %v1006_v19 = vmul.f32 %v2873_v1, %v2267_v53 }
 0x1f8   : > { %v1007_v12 = vmul.f32 %v2875_v60, %v2267_v53  ;;  %1889 = vmatpush3.bf16.xpose.msk.msra.mxu1 %vm2769_vm4, %v1887_v46  ;;  %v1322_v35 = vadd.f32 %v1290_v47, %v1222_v17  ;;  %v839_v18 = vadd.f32 %v807_v33, %v739_v57  ;;  %v1106_v56 = vmul.f32 %v2883_v41, %v2270_v63 }
 0x1f9   : > { %v1107_v58 = vmul.f32 %v2887_v0, %v2270_v63  ;;  %1892 = vmatprep.subr.msk.bf16.mxu1 %vm2769_vm4, %v1890_v45  ;;  %v1421_v37 = vadd.f32 %v1389_v30, %v1321_v40  ;;  %v938_v52 = vadd.f32 %v906_v29, %v838_v62  ;;  %v1207_v46 = vmul.f32 %v2278_v7, %v2984_v59 }
 0x1fa   : > { %v1208_v47 = vmul.f32 %v2278_v7, %v2986_v25  ;;  %v1422_v22 = vadd.f32 %v1390_v13, %v1322_v35  ;;  %v939_v48 = vadd.f32 %v907_v50, %v839_v18  ;;  %v1307_v26 = vmul.f32 %v2280_v8, %v2992_v43  ;;  %v3041_v18 = vld [vmem:[#allocation2 + $0xc0] sm:$0xff] }
 0x1fb   : > { %v1308_v6 = vmul.f32 %v2280_v8, %v2994_v55  ;;  %v1460_v30 = vadd.f32 %v3019_v10, %v1421_v37  ;;  %v1038_v20 = vadd.f32 %v1006_v19, %v938_v52  ;;  %v1407_v34 = vmul.f32 %v2961_v16, %v3002_v24 }
 0x1fc   : > { %v1408_v13 = vmul.f32 %v2961_v16, %v3004_v9  ;;  %v1461_v5 = vadd.f32 %v3019_v10, %v1422_v22  ;;  %v1039_v14 = vadd.f32 %v1007_v12, %v939_v48  ;;  %v590_v54 = vmul.f32 %v2804_v61, %v2249_v27  ;;  %v3051_v22 = vld [vmem:[#allocation2 + $0xc1] sm:$0xff]  ;;  %v3053_v48 = vld [vmem:[#allocation2 + $0xc9] sm:$0xff] }
 0x1fd   : > { %v591_v33 = vmul.f32 %v2813_v3, %v2249_v27  ;;  %v1492_v29 = vmax.f32 %v1460_v30, 0.0  ;;  %v1138_v45 = vadd.f32 %v1106_v56, %v1038_v20  ;;  %v690_v17 = vmul.f32 %v2815_v23, %v2251_v28  ;;  %v3055_v30 = vld [vmem:[#allocation2 + $0xc2] sm:$0xff] }
 0x1fe   : > { %v691_v57 = vmul.f32 %v2821_v11, %v2251_v28  ;;  %v1493_v50 = vmax.f32 %v1461_v5, 0.0  ;;  %v1139_v40 = vadd.f32 %v1107_v58, %v1039_v14  ;;  %v790_v62 = vmul.f32 %v2823_v15, %v2253_v32  ;;  %v3047_v15 = vld [vmem:[#allocation2 + $0xc8] sm:$0xff] }
 0x1ff   : > { %v791_v19 = vmul.f32 %v2829_v2, %v2253_v32  ;;  %v1239_v61 = vadd.f32 %v1207_v46, %v1138_v45  ;;  %v722_v12 = vadd.f32 %v690_v17, %v590_v54  ;;  %v890_v3 = vmul.f32 %v2923_v44, %v2263_v49  ;;  %v3065_v14 = vld [vmem:[#allocation2 + $0xca] sm:$0xff] }
 0x200   : > { %v723_v35 = vadd.f32 %v691_v57, %v591_v33  ;;  %v1893_v23 = vpack.c.bf16 %v1493_v50, %v1492_v29  ;;  %v1240_v56 = vadd.f32 %v1208_v47, %v1139_v40  ;;  %v891_v11 = vmul.f32 %v2927_v42, %v2263_v49 }
 0x201   : > { %v990_v58 = vmul.f32 %v2929_v51, %v2267_v53  ;;  %v1339_v37 = vadd.f32 %v1307_v26, %v1239_v61  ;;  %v822_v2 = vadd.f32 %v790_v62, %v722_v12  ;;  %v991_v46 = vmul.f32 %v2935_v31, %v2267_v53 }
 0x202   : > { %v823_v52 = vadd.f32 %v791_v19, %v723_v35  ;;  %1895 = vmatpush3.bf16.xpose.msk.msra.mxu1 %vm2769_vm4, %v1893_v23  ;;  %v1340_v47 = vadd.f32 %v1308_v6, %v1240_v56  ;;  %v1090_v20 = vmul.f32 %v2937_v4, %v2270_v63  ;;  %v1091_v26 = vmul.f32 %v2943_v21, %v2270_v63 }
 0x203   : > { %v1191_v5 = vmul.f32 %v2278_v7, %v3041_v18  ;;  %v1439_v54 = vadd.f32 %v1407_v34, %v1339_v37  ;;  %v922_v33 = vadd.f32 %v890_v3, %v822_v2  ;;  %v1192_v45 = vmul.f32 %v2278_v7, %v3047_v15 }
 0x204   : > { %v923_v29 = vadd.f32 %v891_v11, %v823_v52  ;;  %v1440_v17 = vadd.f32 %v1408_v13, %v1340_v47  ;;  %v1291_v6 = vmul.f32 %v2280_v8, %v3051_v22  ;;  %v1292_v57 = vmul.f32 %v2280_v8, %v3053_v48  ;;  %v1173_v47 = vld [vmem:[#allocation2 + $0x198] sm:$0xff] }
 0x205   : > { %v1391_v50 = vmul.f32 %v2961_v16, %v3055_v30  ;;  %v1478_v40 = vadd.f32 %v3019_v10, %v1439_v54  ;;  %v1022_v62 = vadd.f32 %v990_v58, %v922_v33  ;;  %v1392_v34 = vmul.f32 %v2961_v16, %v3065_v14  ;;  %v1174_v33 = vld [vmem:[#allocation2 + $0x1a0] sm:$0xff] }
 0x206   : > { %v1023_v19 = vadd.f32 %v991_v46, %v923_v29  ;;  %v1479_v61 = vadd.f32 %v3019_v10, %v1440_v17  ;;  %v608_v13 = vmul.f32 %v2867_v36, %v2249_v27  ;;  %v609_v12 = vmul.f32 %v2871_v38, %v2249_v27 }
 0x207   : > { %v708_v35 = vmul.f32 %v2873_v1, %v2251_v28  ;;  %v1510_v3 = vmax.f32 %v1478_v40, 0.0  ;;  %v1122_v23 = vadd.f32 %v1090_v20, %v1022_v62  ;;  %v709_v11 = vmul.f32 %v2875_v60, %v2251_v28  ;;  %v1373_v40 = vld [vmem:[#allocation2 + $0x19a] sm:$0xff] }
 0x208   : > { %v1123_v56 = vadd.f32 %v1091_v26, %v1023_v19  ;;  %v1511_v58 = vmax.f32 %v1479_v61, 0.0  ;;  %v808_v2 = vmul.f32 %v2883_v41, %v2253_v32  ;;  %v809_v36 = vmul.f32 %v2887_v0, %v2253_v32 }
 0x209   : > { %v740_v37 = vadd.f32 %v708_v35, %v608_v13  ;;  %v1223_v52 = vadd.f32 %v1191_v5, %v1122_v23  ;;  %v741_v38 = vadd.f32 %v709_v11, %v609_v12  ;;  %v908_v1 = vmul.f32 %v2984_v59, %v2263_v49  ;;  %v1273_v5 = vld [vmem:[#allocation2 + $0x199] sm:$0xff] }
 0x20a   : > { %v1224_v46 = vadd.f32 %v1192_v45, %v1123_v56  ;;  %v1896_v20 = vpack.c.bf16 %v1511_v58, %v1510_v3  ;;  %v909_v60 = vmul.f32 %v2986_v25, %v2263_v49  ;;  %v1008_v54 = vmul.f32 %v2992_v43, %v2267_v53  ;;  %v1274_v45 = vld [vmem:[#allocation2 + $0x1a1] sm:$0xff] }
 0x20b   : > { %v840_v26 = vadd.f32 %v808_v2, %v740_v37  ;;  %v1323_v41 = vadd.f32 %v1291_v6, %v1223_v52  ;;  %v841_v17 = vadd.f32 %v809_v36, %v741_v38  ;;  %v1009_v0 = vmul.f32 %v2994_v55, %v2267_v53 }
 0x20c   : > { %v1324_v29 = vadd.f32 %v1292_v57, %v1224_v46  ;;  %1898 = vmatprep.subr.msk.bf16.mxu1 %vm2769_vm4, %v1896_v20  ;;  %v1108_v25 = vmul.f32 %v3002_v24, %v2270_v63  ;;  %v1109_v43 = vmul.f32 %v3004_v9, %v2270_v63  ;;  %v1209_v6 = vmul.f32 %v2278_v7, %v1173_v47  ;;  %v1374_v57 = vld [vmem:[#allocation2 + $0x1a2] sm:$0xff] }
 0x20d   : > { %v940_v59 = vadd.f32 %v908_v1, %v840_v26  ;;  %v1423_v62 = vadd.f32 %v1391_v50, %v1323_v41  ;;  %v941_v61 = vadd.f32 %v909_v60, %v841_v17  ;;  %v1210_v55 = vmul.f32 %v2278_v7, %v1174_v33  ;;  %v1158_v17 = vld [vmem:[#allocation2 + $0xe0] sm:$0xff] }
 0x20e   : > { %v1424_v19 = vadd.f32 %v1392_v34, %v1324_v29  ;;  %v1309_v12 = vmul.f32 %v2280_v8, %v1273_v5  ;;  %v1310_v35 = vmul.f32 %v2280_v8, %v1274_v45  ;;  %v1409_v3 = vmul.f32 %v2961_v16, %v1373_v40  ;;  %v1157_v29 = vld [vmem:[#allocation2 + $0xd8] sm:$0xff] }
 0x20f   : > { %v1040_v13 = vadd.f32 %v1008_v54, %v940_v59  ;;  %v1462_v24 = vadd.f32 %v3019_v10, %v1423_v62  ;;  %v1041_v9 = vadd.f32 %v1009_v0, %v941_v61  ;;  %v1410_v56 = vmul.f32 %v2961_v16, %v1374_v57 }
 0x210   : > { %v1463_v23 = vadd.f32 %v3019_v10, %v1424_v19  ;;  %v592_v50 = vmul.f32 %v2923_v44, %v2249_v27  ;;  %v593_v34 = vmul.f32 %v2927_v42, %v2249_v27  ;;  %v692_v58 = vmul.f32 %v2929_v51, %v2251_v28  ;;  %v1358_v19 = vld [vmem:[#allocation2 + $0xe2] sm:$0xff] }
 0x211   : > { %v1140_v11 = vadd.f32 %v1108_v25, %v1040_v13  ;;  %v1494_v37 = vmax.f32 %v1462_v24, 0.0  ;;  %v1141_v36 = vadd.f32 %v1109_v43, %v1041_v9  ;;  %v693_v52 = vmul.f32 %v2935_v31, %v2251_v28  ;;  %v1258_v25 = vld [vmem:[#allocation2 + $0xe1] sm:$0xff] }
 0x212   : > { %v1495_v2 = vmax.f32 %v1463_v23, 0.0  ;;  %v724_v38 = vadd.f32 %v692_v58, %v592_v50  ;;  %v792_v1 = vmul.f32 %v2937_v4, %v2253_v32  ;;  %v793_v44 = vmul.f32 %v2943_v21, %v2253_v32 }
 0x213   : > { %v1241_v46 = vadd.f32 %v1209_v6, %v1140_v11  ;;  %v1242_v20 = vadd.f32 %v1210_v55, %v1141_v36  ;;  %v725_v27 = vadd.f32 %v693_v52, %v593_v34  ;;  %v892_v42 = vmul.f32 %v3041_v18, %v2263_v49  ;;  %v1954_v11 = vld [vmem:[%s3211_s5] sm:$0xf] }
 0x214   : > { %v1899_v47 = vpack.c.bf16 %v1495_v2, %v1494_v37  ;;  %v824_v26 = vadd.f32 %v792_v1, %v724_v38  ;;  %v893_v60 = vmul.f32 %v3047_v15, %v2263_v49  ;;  %v992_v32 = vmul.f32 %v3051_v22, %v2267_v53  ;;  %v1257_v22 = vld [vmem:[#allocation2 + $0xd9] sm:$0xff] }
 0x215   : > { %v1341_v51 = vadd.f32 %v1309_v12, %v1241_v46  ;;  %v1342_v28 = vadd.f32 %v1310_v35, %v1242_v20  ;;  %v825_v31 = vadd.f32 %v793_v44, %v725_v27  ;;  %v1092_v21 = vmul.f32 %v3055_v30, %v2270_v63  ;;  %v1955_v37 = vld [vmem:[%s2124_s21] sm:$0xff]  ;;  %s1956_s21 = scalar_lea.vmem %s3166_s19, 128 }
 0x216   : > { %1901 = vmatpush3.bf16.xpose.msk.msra.mxu1 %vm2769_vm4, %v1899_v47  ;;  %v924_v54 = vadd.f32 %v892_v42, %v824_v26  ;;  %v993_v41 = vmul.f32 %v3053_v48, %v2267_v53  ;;  %v1093_v45 = vmul.f32 %v3065_v14, %v2270_v63  ;;  %v1193_v30 = vmul.f32 %v2278_v7, %v1157_v29  ;;  %v1357_v48 = vld [vmem:[#allocation2 + $0xda] sm:$0xff]  ;;  %p1957_p11 = scmp.ne.s32.totalorder %s3166_s19, %s1956_s21  ;;  %p1964_p1 = scmp.lt.s32.totalorder %s1962_s9, %s1956_s21 }
 0x217   : > { %v1441_v4 = vadd.f32 %v1409_v3, %v1341_v51  ;;  %v1442_v33 = vadd.f32 %v1410_v56, %v1342_v28  ;;  %v925_v18 = vadd.f32 %v893_v60, %v825_v31  ;;  %v1194_v53 = vmul.f32 %v2278_v7, %v1158_v17 }
 0x218   : > { %v1024_v15 = vadd.f32 %v992_v32, %v924_v54  ;;  %v1293_v62 = vmul.f32 %v2280_v8, %v1257_v22  ;;  %v1294_v13 = vmul.f32 %v2280_v8, %v1258_v25  ;;  %v1393_v14 = vmul.f32 %v2961_v16, %v1357_v48  ;;  %p1958_p12 = pnand %p1957_p11, %p2101_p5  ;;  %p1965_p2 = por %p1964_p1, %p1963_p0 }
 0x219   : > { %v1480_v49 = vadd.f32 %v3019_v10, %v1441_v4  ;;  %v1481_v0 = vadd.f32 %v3019_v10, %v1442_v33  ;;  %v1025_v5 = vadd.f32 %v993_v41, %v925_v18  ;;  %v1394_v35 = vmul.f32 %v2961_v16, %v1358_v19 }
 0x21a   : > { %v1124_v59 = vadd.f32 %v1092_v21, %v1024_v15  ;;  %p1959_p13 = pneg %p1958_p12 }
 0x21b   : > { %v1512_v40 = vmax.f32 %v1480_v49, 0.0  ;;  %v1513_v43 = vmax.f32 %v1481_v0, 0.0  ;;  %v1125_v6 = vadd.f32 %v1093_v45, %v1025_v5 }
 0x21c   : > { %v1225_v57 = vadd.f32 %v1193_v30, %v1124_v59  ;;  %p1966_p3 = pnand %p1965_p2, %p1959_p13 }
 0x21d   : > { %v1902_v61 = vpack.c.bf16 %v1513_v43, %v1512_v40  ;;  %v1226_v55 = vadd.f32 %v1194_v53, %v1125_v6 }
 0x21e   : > { %v1325_v63 = vadd.f32 %v1293_v62, %v1225_v57 }
 0x21f   : > { %1904 = vmatprep.subr.msk.bf16.mxu1 %vm2769_vm4, %v1902_v61  ;;  %v1326_v12 = vadd.f32 %v1294_v13, %v1226_v55 }
 0x220   : > { %v1425_v7 = vadd.f32 %v1393_v14, %v1325_v63 }
 0x221   : > { %v1426_v3 = vadd.f32 %v1394_v35, %v1326_v12 }
 0x222   : > { %v1464_v24 = vadd.f32 %v3019_v10, %v1425_v7 }
 0x223   : > { %v1465_v23 = vadd.f32 %v3019_v10, %v1426_v3 }
 0x224   : > { %v1496_v9 = vmax.f32 %v1464_v24, 0.0 }
 0x225   : > { %v1497_v8 = vmax.f32 %v1465_v23, 0.0 }
 0x227   : > { %v1905_v56 = vpack.c.bf16 %v1497_v8, %v1496_v9 }
 0x229   : > { %1907 = vmatpush3.bf16.xpose.msk.msra.mxu1 %vm2769_vm4, %v1905_v56 }
 0x22e   : > { %v1519_v16 = vpop.permute.xlu1 %1518 }
 0x230   : > { %1859 = vmatmul.mubr.msk.f32.vlgmr.msra.gmra.mrb[0].mxu1 %vm387_vm2, %v1954_v11 }
 0x303   : > { %v1686_v50 = vpop.f32.mrb[0].mxu1 }
 0x304   : > { %v1687_v34 = vadd.f32 %v1686_v50, %v1519_v16  ;;  %v1688_v10 = vpop.f32.mrb[1].mxu1 }
 0x305   : > { %v1689_v58 = vadd.f32 %v1688_v10, %v1519_v16 }
 0x306   : > { %v1692_v2 = vadd.f32 %v1955_v37, %v1687_v34 }
 0x307   : > { %v1693_v36 = vadd.f32 %v1689_v58, %v3256_v39 }
 0x309   : > { %v1696_v52 = vcombine.low %v1692_v2, %v1693_v36 }
 0x30b   : > { %1698 = vst [vmem:[%s271_s18] sm:$0xff] %v1696_v52 }
 0x30c   : > { %1969 = shalt.err (!%p1966_p3)
}
 0x30d   : > { %s1970_s13 = scalar_lea.hbm %s3164_s23, 128  ;;  %s1974_s16 = scalar_lea.hbm %s3213_s7, 256 }
 0x30e   : > { %p1971_p4 = scmp.ne.s32.totalorder %s3164_s23, %s1970_s13  ;;  %p1975_p9 = scmp.lt.u32.totalorder %s3164_s23, %s3213_s7 }
 0x30f   : > { %p1976_p10 = scmp.lt.u32.totalorder %s1974_s16, %s1970_s13  ;;  %p1978_p12 = scmp.lt.u32.totalorder %s1970_s13, %s3164_s23 }
 0x310   : > { %p1972_p7 = pnand %p1971_p4, %p2101_p5 }
 0x311   : > { %p1977_p11 = por %p1976_p10, %p1975_p9 }
 0x312   : > { %p1973_p8 = pneg %p1972_p7 }
 0x313   : > { %p1979_p13 = por %p1978_p12, %p1977_p11 }
 0x315   : > { %p1980_p0 = pnand %p1979_p13, %p1973_p8 }
 0x317   : > { %1983 = shalt.err (!%p1980_p0)
}
 0x318   : > { %1908 = dma.vmem_to_hbm [thread:$0]  (%p2101_p5), %s3166_s19, 128, %s3164_s23, %s1700_s29  }
 0x319 PF: > { %p1914_p1 = scmp.ge.s32.totalorder %s2018_s27, 2  ;;  %s1726_s20 = sand.u32 1, %s2006_s24  }
 0x31a   : > { %s1727_s22 = scalar_lea.sflag [#allocation4], %s1726_s20 }
 0x31b   : > { %p1911_p2 = pnand %p1914_p1, %p2105_p6 }
 0x31d   : > { %2001 = dma.done.wait (!%p1911_p2), %s1727_s22, 128  }
 0x31e   : > { %2003 = vsyncadd (!%p1911_p2), %s1727_s22, 4294967168  ;;  %p17_p3 = scmp.ge.s32.totalorder %s2088_s30, 4   ;;  %s3257_s24 = smov %s2010_s25 }
 0x31f   : > { %s3258_s25 = smov %s2014_s26  ;;  %s3259_s26 = smov %s2099_s10 }
 0x320   : > { %s3260_s27 = smov %s2088_s30  ;;  %19 = sbr.rel (!%p17_p3) target bundleno = 3 (0x3), region = 85 }
 0x327   :  { %1732 = vsyncpa [#allocation4], 1 }
 0x328   :  { %1734 = vsyncpa [#allocation4 + $0x1], 1 }

</bundles_post_ra>
